<compile_context>
chip_gen: v6e
topology: v6e:2x2x1
jax: 0.10.0
libtpu: 0.0.40
codegen_flags: <defaults>
</compile_context>

<pallas_src>
import numpy as np
import jax
import jax.numpy as jnp
from jax.experimental import pallas as pl
from jax.experimental.pallas import tpu as pltpu


def _mlp_dims(input_size, hidden_size):
    h = hidden_size
    return [input_size, h, h, h, h, h // 2, h // 4, 1]


def _make_fused_kernel(n_lin, num_models, hidden_size, ln_dims):
    """Fused-ensemble MLP forward.

    Activations stay lane-fused as (batch_tile, num_models*hidden_size);
    model m owns lanes [m*H, (m+1)*H).  Lanes beyond a layer's real width
    are kept exactly 0 (zero weight columns + zero gamma/beta on pad lanes).
    """
    M, H = num_models, hidden_size
    n_ln = n_lin - 1  # number of LayerNorm+ReLU blocks

    def kernel(x_ref, w_ref, v_ref, o_ref):
        h = x_ref[...].astype(jnp.float32)               # (bt, M*H)
        for l in range(n_lin):
            w = w_ref[l]                                 # (M*H, M*H) block-diag fused weight
            b = v_ref[pl.ds(l, 1), :]                    # (1, M*H)  fused bias
            h = jnp.dot(h, w, preferred_element_type=jnp.float32) + b
            if l < n_ln:
                d = ln_dims[l]                           # real per-model width of this layer
                gamma = v_ref[pl.ds(n_lin + l, 1), :]        # (1, M*H), 0 on pad lanes
                beta = v_ref[pl.ds(n_lin + n_ln + l, 1), :]  # (1, M*H), 0 on pad lanes
                segs = []
                for m in range(M):                       # per-model LayerNorm statistics
                    lo = m * H
                    full = h[:, lo:lo + H]               # model m's segment (pads are 0)
                    real = full if d == H else full[:, :d]
                    mu = jnp.mean(real, axis=-1, keepdims=True)
                    var = jnp.mean(jnp.square(real - mu), axis=-1, keepdims=True)
                    inv = jax.lax.rsqrt(var + 1e-5)
                    segs.append((full - mu) * inv)
                # zero gamma/beta on pad lanes resets them to exactly 0
                h = jnp.concatenate(segs, axis=-1) * gamma + beta
                h = jnp.maximum(h, 0.0)                  # ReLU; Dropout(p=0.0) is identity
        # Ensemble mean is folded into the last layer's (1/M-scaled) weights:
        # column 0 already holds mean_m(model_m(x)).
        o_ref[...] = h[:, 0:1]

    return kernel


def init_ensemble_params(key, input_size, hidden_size, num_models):
    """Deterministic synthetic per-model parameters (nested Python lists)."""
    dims = _mlp_dims(input_size, hidden_size)
    n_lin = len(dims) - 1
    weights, biases, gammas, betas = [], [], [], []
    for _ in range(num_models):
        wm, bm, gm, btm = [], [], [], []
        for l in range(n_lin):
            d_in, d_out = dims[l], dims[l + 1]
            key, kw, kb = jax.random.split(key, 3)
            s = float(1.0 / np.sqrt(d_in))
            wm.append(jax.random.uniform(kw, (d_in, d_out), jnp.float32, -s, s))
            bm.append(jax.random.uniform(kb, (d_out,), jnp.float32, -s, s))
            if l < n_lin - 1:
                # randomized affine params so the LN gamma/beta path is exercised
                key, kg, kb2 = jax.random.split(key, 3)
                gm.append(jax.random.uniform(kg, (d_out,), jnp.float32, 0.5, 1.5))
                btm.append(jax.random.uniform(kb2, (d_out,), jnp.float32, -0.5, 0.5))
        weights.append(wm); biases.append(bm); gammas.append(gm); betas.append(btm)
    return dims, (weights, biases, gammas, betas)


def pack_ensemble(dims, params, num_models, hidden_size):
    """Pack all per-model parameters into two fused buffers:
       w_buf: (n_lin, M*H, M*H)  block-diagonal weights (last layer scaled 1/M)
       v_buf: (n_lin + 2*(n_lin-1), M*H)  rows = biases, then gammas, then betas
    """
    weights, biases, gammas, betas = params
    M, H = num_models, hidden_size
    F = M * H
    n_lin = len(dims) - 1
    n_ln = n_lin - 1
    assert dims[0] <= F, "input_size must fit within the fused lane width M*H"

    w_buf = np.zeros((n_lin, F, F), np.float32)
    v_buf = np.zeros((n_lin + 2 * n_ln, F), np.float32)
    for l in range(n_lin):
        d_in, d_out = dims[l], dims[l + 1]
        for m in range(M):
            w = np.asarray(weights[m][l], np.float32)
            b = np.asarray(biases[m][l], np.float32)
            if l == 0:
                # shared input rows -> per-model output column blocks
                w_buf[l, :d_in, m * H:m * H + d_out] = w
            elif l == n_lin - 1:
                # final layer: fold the ensemble mean (1/M) and map all models to col 0
                w_buf[l, m * H:m * H + d_in, 0] = w[:, 0] / M
            else:
                w_buf[l, m * H:m * H + d_in, m * H:m * H + d_out] = w
            if l == n_lin - 1:
                v_buf[l, 0] += b[0] / M
            else:
                v_buf[l, m * H:m * H + d_out] = b
        if l < n_ln:
            for m in range(M):
                v_buf[n_lin + l, m * H:m * H + d_out] = np.asarray(gammas[m][l], np.float32)
                v_buf[n_lin + n_ln + l, m * H:m * H + d_out] = np.asarray(betas[m][l], np.float32)

    ln_dims = [dims[l + 1] for l in range(n_ln)]
    return jnp.asarray(w_buf), jnp.asarray(v_buf), ln_dims


def ensemble_forward(x, w_buf, v_buf, ln_dims, *, num_models, hidden_size,
                     batch_tile=None):
    B, in_dim = x.shape
    F = num_models * hidden_size
    n_lin = w_buf.shape[0]
    if batch_tile is None:
        batch_tile = B if B <= 256 else 256
    assert B % batch_tile == 0

    # pad shared input features into the fused lane width (extra lanes are 0)
    x_pad = jnp.pad(x.astype(jnp.float32), ((0, 0), (0, F - in_dim)))

    kernel = _make_fused_kernel(n_lin, num_models, hidden_size, ln_dims)

    return pl.pallas_call(
        kernel,
        out_shape=jax.ShapeDtypeStruct((B, 1), jnp.float32),
        grid_spec=pltpu.PrefetchScalarGridSpec(
            num_scalar_prefetch=0,
            grid=(B // batch_tile,),                     # batch tiles only
            in_specs=[
                pl.BlockSpec((batch_tile, F), lambda i: (i, 0)),
                pl.BlockSpec(w_buf.shape, lambda i: (0, 0, 0)),   # one packed weight DMA
                pl.BlockSpec(v_buf.shape, lambda i: (0, 0)),      # one packed vector DMA
            ],
            out_specs=pl.BlockSpec((batch_tile, 1), lambda i: (i, 0)),
        ),
        compiler_params=pltpu.CompilerParams(
            dimension_semantics=("parallel",),           # independent batch tiles
        ),
    )(x_pad, w_buf, v_buf)


def ensemble_reference(x, dims, params, num_models):
    """Pure-JAX reference matching the PyTorch module."""
    weights, biases, gammas, betas = params
    n_lin = len(dims) - 1
    outs = []
    for m in range(num_models):
        h = x.astype(jnp.float32)
        for l in range(n_lin):
            h = h @ weights[m][l] + biases[m][l]
            if l < n_lin - 1:
                mu = jnp.mean(h, axis=-1, keepdims=True)
                var = jnp.mean((h - mu) ** 2, axis=-1, keepdims=True)
                h = (h - mu) * jax.lax.rsqrt(var + 1e-5) * gammas[m][l] + betas[m][l]
                h = jnp.maximum(h, 0.0)
        outs.append(h)
    return sum(outs) / num_models


if __name__ == "__main__":
    BATCH = 8
    INPUT_SIZE = 16
    HIDDEN_SIZE = 32
    NUM_MODELS = 3

    key = jax.random.PRNGKey(0)
    key, kx = jax.random.split(key)
    x = jax.random.normal(kx, (BATCH, INPUT_SIZE), jnp.float32)

    dims, params = init_ensemble_params(key, INPUT_SIZE, HIDDEN_SIZE, NUM_MODELS)
    w_buf, v_buf, ln_dims = pack_ensemble(dims, params, NUM_MODELS, HIDDEN_SIZE)

    out = ensemble_forward(x, w_buf, v_buf, ln_dims,
                           num_models=NUM_MODELS, hidden_size=HIDDEN_SIZE)
    out = jax.block_until_ready(out)

    ref = ensemble_reference(x, dims, params, NUM_MODELS)
    assert out.shape == (BATCH, 1), out.shape
    assert jnp.allclose(out, ref, atol=1e-3, rtol=1e-3), (out, ref)

    print("KERNEL_OK")
</pallas_src>

<mosaic_0001>
module attributes {stable_mosaic.version = 11 : i64} {
  func.func @kernel(%arg0: i32, %arg1: memref<8x96xf32, #tpu.memory_space<vmem>>, %arg2: memref<7x96x96xf32, #tpu.memory_space<vmem>>, %arg3: memref<19x96xf32, #tpu.memory_space<vmem>>, %arg4: memref<8x1xf32, #tpu.memory_space<vmem>>) attributes {dimension_semantics = [#tpu.dimension_semantics<parallel>], iteration_bounds = array<i64: 1>, scalar_prefetch = 0 : i64, scratch_operands = 0 : i64, tpu.core_type = #tpu.core_type<tc>, window_params = [{transform_indices = @transform_0, window_bounds = array<i64: 8, 96>}, {pipeline_mode = #tpu.pipeline_mode<synchronous>, transform_indices = @transform_1, window_bounds = array<i64: 7, 96, 96>}, {pipeline_mode = #tpu.pipeline_mode<synchronous>, transform_indices = @transform_2, window_bounds = array<i64: 19, 96>}, {transform_indices = @transform_3, window_bounds = array<i64: 8, 1>}]} {
    %c0 = arith.constant 0 : index
    %c0_0 = arith.constant 0 : index
    %0 = vector.load %arg1[%c0, %c0_0] : memref<8x96xf32, #tpu.memory_space<vmem>>, vector<8x96xf32>
    %c0_1 = arith.constant 0 : index
    %c0_2 = arith.constant 0 : index
    %c0_3 = arith.constant 0 : index
    %1 = vector.load %arg2[%c0_1, %c0_2, %c0_3] : memref<7x96x96xf32, #tpu.memory_space<vmem>>, vector<1x96x96xf32>
    %2 = vector.shape_cast %1 : vector<1x96x96xf32> to vector<96x96xf32>
    %c0_4 = arith.constant 0 : index
    %c0_5 = arith.constant 0 : index
    %3 = vector.load %arg3[%c0_4, %c0_5] : memref<19x96xf32, #tpu.memory_space<vmem>>, vector<1x96xf32>
    %cst = arith.constant dense<0.000000e+00> : vector<8x96xf32>
    %4 = tpu.matmul %0, %2, %cst {dimension_numbers = #tpu.dot_dimension_numbers<[1], [0], [0], [1], [0, 0, 1, 1], [], []>} : vector<8x96xf32>, vector<96x96xf32>, vector<8x96xf32> -> vector<8x96xf32>
    %5 = vector.broadcast %3 : vector<1x96xf32> to vector<8x96xf32>
    %6 = arith.addf %4, %5 : vector<8x96xf32>
    %c7 = arith.constant 7 : index
    %c0_6 = arith.constant 0 : index
    %7 = vector.load %arg3[%c7, %c0_6] : memref<19x96xf32, #tpu.memory_space<vmem>>, vector<1x96xf32>
    %c13 = arith.constant 13 : index
    %c0_7 = arith.constant 0 : index
    %8 = vector.load %arg3[%c13, %c0_7] : memref<19x96xf32, #tpu.memory_space<vmem>>, vector<1x96xf32>
    %9 = vector.extract_strided_slice %6 {offsets = [0, 0], sizes = [8, 32], strides = [1, 1]} : vector<8x96xf32> to vector<8x32xf32>
    %cst_8 = arith.constant dense<0.000000e+00> : vector<8xf32>
    %10 = vector.multi_reduction <add>, %9, %cst_8 [1] : vector<8x32xf32> to vector<8xf32>
    %11 = vector.shape_cast %10 : vector<8xf32> to vector<8x1xf32>
    %cst_9 = arith.constant 3.200000e+01 : f32
    %12 = vector.broadcast %cst_9 : f32 to vector<8x1xf32>
    %13 = arith.divf %11, %12 : vector<8x1xf32>
    %14 = vector.broadcast %13 : vector<8x1xf32> to vector<8x32xf32>
    %15 = arith.subf %9, %14 : vector<8x32xf32>
    %16 = arith.mulf %15, %15 : vector<8x32xf32>
    %cst_10 = arith.constant dense<0.000000e+00> : vector<8xf32>
    %17 = vector.multi_reduction <add>, %16, %cst_10 [1] : vector<8x32xf32> to vector<8xf32>
    %18 = vector.shape_cast %17 : vector<8xf32> to vector<8x1xf32>
    %cst_11 = arith.constant 3.200000e+01 : f32
    %19 = vector.broadcast %cst_11 : f32 to vector<8x1xf32>
    %20 = arith.divf %18, %19 : vector<8x1xf32>
    %cst_12 = arith.constant 9.99999974E-6 : f32
    %21 = vector.broadcast %cst_12 : f32 to vector<8x1xf32>
    %22 = arith.addf %20, %21 : vector<8x1xf32>
    %23 = math.rsqrt %22 : vector<8x1xf32>
    %24 = vector.broadcast %13 : vector<8x1xf32> to vector<8x32xf32>
    %25 = arith.subf %9, %24 : vector<8x32xf32>
    %26 = vector.broadcast %23 : vector<8x1xf32> to vector<8x32xf32>
    %27 = arith.mulf %25, %26 : vector<8x32xf32>
    %28 = vector.extract_strided_slice %6 {offsets = [0, 32], sizes = [8, 32], strides = [1, 1]} : vector<8x96xf32> to vector<8x32xf32>
    %cst_13 = arith.constant dense<0.000000e+00> : vector<8xf32>
    %29 = vector.multi_reduction <add>, %28, %cst_13 [1] : vector<8x32xf32> to vector<8xf32>
    %30 = vector.shape_cast %29 : vector<8xf32> to vector<8x1xf32>
    %cst_14 = arith.constant 3.200000e+01 : f32
    %31 = vector.broadcast %cst_14 : f32 to vector<8x1xf32>
    %32 = arith.divf %30, %31 : vector<8x1xf32>
    %33 = vector.broadcast %32 : vector<8x1xf32> to vector<8x32xf32>
    %34 = arith.subf %28, %33 : vector<8x32xf32>
    %35 = arith.mulf %34, %34 : vector<8x32xf32>
    %cst_15 = arith.constant dense<0.000000e+00> : vector<8xf32>
    %36 = vector.multi_reduction <add>, %35, %cst_15 [1] : vector<8x32xf32> to vector<8xf32>
    %37 = vector.shape_cast %36 : vector<8xf32> to vector<8x1xf32>
    %cst_16 = arith.constant 3.200000e+01 : f32
    %38 = vector.broadcast %cst_16 : f32 to vector<8x1xf32>
    %39 = arith.divf %37, %38 : vector<8x1xf32>
    %cst_17 = arith.constant 9.99999974E-6 : f32
    %40 = vector.broadcast %cst_17 : f32 to vector<8x1xf32>
    %41 = arith.addf %39, %40 : vector<8x1xf32>
    %42 = math.rsqrt %41 : vector<8x1xf32>
    %43 = vector.broadcast %32 : vector<8x1xf32> to vector<8x32xf32>
    %44 = arith.subf %28, %43 : vector<8x32xf32>
    %45 = vector.broadcast %42 : vector<8x1xf32> to vector<8x32xf32>
    %46 = arith.mulf %44, %45 : vector<8x32xf32>
    %47 = vector.extract_strided_slice %6 {offsets = [0, 64], sizes = [8, 32], strides = [1, 1]} : vector<8x96xf32> to vector<8x32xf32>
    %cst_18 = arith.constant dense<0.000000e+00> : vector<8xf32>
    %48 = vector.multi_reduction <add>, %47, %cst_18 [1] : vector<8x32xf32> to vector<8xf32>
    %49 = vector.shape_cast %48 : vector<8xf32> to vector<8x1xf32>
    %cst_19 = arith.constant 3.200000e+01 : f32
    %50 = vector.broadcast %cst_19 : f32 to vector<8x1xf32>
    %51 = arith.divf %49, %50 : vector<8x1xf32>
    %52 = vector.broadcast %51 : vector<8x1xf32> to vector<8x32xf32>
    %53 = arith.subf %47, %52 : vector<8x32xf32>
    %54 = arith.mulf %53, %53 : vector<8x32xf32>
    %cst_20 = arith.constant dense<0.000000e+00> : vector<8xf32>
    %55 = vector.multi_reduction <add>, %54, %cst_20 [1] : vector<8x32xf32> to vector<8xf32>
    %56 = vector.shape_cast %55 : vector<8xf32> to vector<8x1xf32>
    %cst_21 = arith.constant 3.200000e+01 : f32
    %57 = vector.broadcast %cst_21 : f32 to vector<8x1xf32>
    %58 = arith.divf %56, %57 : vector<8x1xf32>
    %cst_22 = arith.constant 9.99999974E-6 : f32
    %59 = vector.broadcast %cst_22 : f32 to vector<8x1xf32>
    %60 = arith.addf %58, %59 : vector<8x1xf32>
    %61 = math.rsqrt %60 : vector<8x1xf32>
    %62 = vector.broadcast %51 : vector<8x1xf32> to vector<8x32xf32>
    %63 = arith.subf %47, %62 : vector<8x32xf32>
    %64 = vector.broadcast %61 : vector<8x1xf32> to vector<8x32xf32>
    %65 = arith.mulf %63, %64 : vector<8x32xf32>
    %66 = tpu.concatenate %27, %46, %65 in 1 : vector<8x32xf32>, vector<8x32xf32>, vector<8x32xf32> -> vector<8x96xf32>
    %67 = vector.broadcast %7 : vector<1x96xf32> to vector<8x96xf32>
    %68 = arith.mulf %66, %67 : vector<8x96xf32>
    %69 = vector.broadcast %8 : vector<1x96xf32> to vector<8x96xf32>
    %70 = arith.addf %68, %69 : vector<8x96xf32>
    %cst_23 = arith.constant 0.000000e+00 : f32
    %71 = vector.broadcast %cst_23 : f32 to vector<8x96xf32>
    %72 = arith.maximumf %70, %71 : vector<8x96xf32>
    %c1 = arith.constant 1 : index
    %c0_24 = arith.constant 0 : index
    %c0_25 = arith.constant 0 : index
    %73 = vector.load %arg2[%c1, %c0_24, %c0_25] : memref<7x96x96xf32, #tpu.memory_space<vmem>>, vector<1x96x96xf32>
    %74 = vector.shape_cast %73 : vector<1x96x96xf32> to vector<96x96xf32>
    %c1_26 = arith.constant 1 : index
    %c0_27 = arith.constant 0 : index
    %75 = vector.load %arg3[%c1_26, %c0_27] : memref<19x96xf32, #tpu.memory_space<vmem>>, vector<1x96xf32>
    %cst_28 = arith.constant dense<0.000000e+00> : vector<8x96xf32>
    %76 = tpu.matmul %72, %74, %cst_28 {dimension_numbers = #tpu.dot_dimension_numbers<[1], [0], [0], [1], [0, 0, 1, 1], [], []>} : vector<8x96xf32>, vector<96x96xf32>, vector<8x96xf32> -> vector<8x96xf32>
    %77 = vector.broadcast %75 : vector<1x96xf32> to vector<8x96xf32>
    %78 = arith.addf %76, %77 : vector<8x96xf32>
    %c8 = arith.constant 8 : index
    %c0_29 = arith.constant 0 : index
    %79 = vector.load %arg3[%c8, %c0_29] : memref<19x96xf32, #tpu.memory_space<vmem>>, vector<1x96xf32>
    %c14 = arith.constant 14 : index
    %c0_30 = arith.constant 0 : index
    %80 = vector.load %arg3[%c14, %c0_30] : memref<19x96xf32, #tpu.memory_space<vmem>>, vector<1x96xf32>
    %81 = vector.extract_strided_slice %78 {offsets = [0, 0], sizes = [8, 32], strides = [1, 1]} : vector<8x96xf32> to vector<8x32xf32>
    %cst_31 = arith.constant dense<0.000000e+00> : vector<8xf32>
    %82 = vector.multi_reduction <add>, %81, %cst_31 [1] : vector<8x32xf32> to vector<8xf32>
    %83 = vector.shape_cast %82 : vector<8xf32> to vector<8x1xf32>
    %cst_32 = arith.constant 3.200000e+01 : f32
    %84 = vector.broadcast %cst_32 : f32 to vector<8x1xf32>
    %85 = arith.divf %83, %84 : vector<8x1xf32>
    %86 = vector.broadcast %85 : vector<8x1xf32> to vector<8x32xf32>
    %87 = arith.subf %81, %86 : vector<8x32xf32>
    %88 = arith.mulf %87, %87 : vector<8x32xf32>
    %cst_33 = arith.constant dense<0.000000e+00> : vector<8xf32>
    %89 = vector.multi_reduction <add>, %88, %cst_33 [1] : vector<8x32xf32> to vector<8xf32>
    %90 = vector.shape_cast %89 : vector<8xf32> to vector<8x1xf32>
    %cst_34 = arith.constant 3.200000e+01 : f32
    %91 = vector.broadcast %cst_34 : f32 to vector<8x1xf32>
    %92 = arith.divf %90, %91 : vector<8x1xf32>
    %cst_35 = arith.constant 9.99999974E-6 : f32
    %93 = vector.broadcast %cst_35 : f32 to vector<8x1xf32>
    %94 = arith.addf %92, %93 : vector<8x1xf32>
    %95 = math.rsqrt %94 : vector<8x1xf32>
    %96 = vector.broadcast %85 : vector<8x1xf32> to vector<8x32xf32>
    %97 = arith.subf %81, %96 : vector<8x32xf32>
    %98 = vector.broadcast %95 : vector<8x1xf32> to vector<8x32xf32>
    %99 = arith.mulf %97, %98 : vector<8x32xf32>
    %100 = vector.extract_strided_slice %78 {offsets = [0, 32], sizes = [8, 32], strides = [1, 1]} : vector<8x96xf32> to vector<8x32xf32>
    %cst_36 = arith.constant dense<0.000000e+00> : vector<8xf32>
    %101 = vector.multi_reduction <add>, %100, %cst_36 [1] : vector<8x32xf32> to vector<8xf32>
    %102 = vector.shape_cast %101 : vector<8xf32> to vector<8x1xf32>
    %cst_37 = arith.constant 3.200000e+01 : f32
    %103 = vector.broadcast %cst_37 : f32 to vector<8x1xf32>
    %104 = arith.divf %102, %103 : vector<8x1xf32>
    %105 = vector.broadcast %104 : vector<8x1xf32> to vector<8x32xf32>
    %106 = arith.subf %100, %105 : vector<8x32xf32>
    %107 = arith.mulf %106, %106 : vector<8x32xf32>
    %cst_38 = arith.constant dense<0.000000e+00> : vector<8xf32>
    %108 = vector.multi_reduction <add>, %107, %cst_38 [1] : vector<8x32xf32> to vector<8xf32>
    %109 = vector.shape_cast %108 : vector<8xf32> to vector<8x1xf32>
    %cst_39 = arith.constant 3.200000e+01 : f32
    %110 = vector.broadcast %cst_39 : f32 to vector<8x1xf32>
    %111 = arith.divf %109, %110 : vector<8x1xf32>
    %cst_40 = arith.constant 9.99999974E-6 : f32
    %112 = vector.broadcast %cst_40 : f32 to vector<8x1xf32>
    %113 = arith.addf %111, %112 : vector<8x1xf32>
    %114 = math.rsqrt %113 : vector<8x1xf32>
    %115 = vector.broadcast %104 : vector<8x1xf32> to vector<8x32xf32>
    %116 = arith.subf %100, %115 : vector<8x32xf32>
    %117 = vector.broadcast %114 : vector<8x1xf32> to vector<8x32xf32>
    %118 = arith.mulf %116, %117 : vector<8x32xf32>
    %119 = vector.extract_strided_slice %78 {offsets = [0, 64], sizes = [8, 32], strides = [1, 1]} : vector<8x96xf32> to vector<8x32xf32>
    %cst_41 = arith.constant dense<0.000000e+00> : vector<8xf32>
    %120 = vector.multi_reduction <add>, %119, %cst_41 [1] : vector<8x32xf32> to vector<8xf32>
    %121 = vector.shape_cast %120 : vector<8xf32> to vector<8x1xf32>
    %cst_42 = arith.constant 3.200000e+01 : f32
    %122 = vector.broadcast %cst_42 : f32 to vector<8x1xf32>
    %123 = arith.divf %121, %122 : vector<8x1xf32>
    %124 = vector.broadcast %123 : vector<8x1xf32> to vector<8x32xf32>
    %125 = arith.subf %119, %124 : vector<8x32xf32>
    %126 = arith.mulf %125, %125 : vector<8x32xf32>
    %cst_43 = arith.constant dense<0.000000e+00> : vector<8xf32>
    %127 = vector.multi_reduction <add>, %126, %cst_43 [1] : vector<8x32xf32> to vector<8xf32>
    %128 = vector.shape_cast %127 : vector<8xf32> to vector<8x1xf32>
    %cst_44 = arith.constant 3.200000e+01 : f32
    %129 = vector.broadcast %cst_44 : f32 to vector<8x1xf32>
    %130 = arith.divf %128, %129 : vector<8x1xf32>
    %cst_45 = arith.constant 9.99999974E-6 : f32
    %131 = vector.broadcast %cst_45 : f32 to vector<8x1xf32>
    %132 = arith.addf %130, %131 : vector<8x1xf32>
    %133 = math.rsqrt %132 : vector<8x1xf32>
    %134 = vector.broadcast %123 : vector<8x1xf32> to vector<8x32xf32>
    %135 = arith.subf %119, %134 : vector<8x32xf32>
    %136 = vector.broadcast %133 : vector<8x1xf32> to vector<8x32xf32>
    %137 = arith.mulf %135, %136 : vector<8x32xf32>
    %138 = tpu.concatenate %99, %118, %137 in 1 : vector<8x32xf32>, vector<8x32xf32>, vector<8x32xf32> -> vector<8x96xf32>
    %139 = vector.broadcast %79 : vector<1x96xf32> to vector<8x96xf32>
    %140 = arith.mulf %138, %139 : vector<8x96xf32>
    %141 = vector.broadcast %80 : vector<1x96xf32> to vector<8x96xf32>
    %142 = arith.addf %140, %141 : vector<8x96xf32>
    %cst_46 = arith.constant 0.000000e+00 : f32
    %143 = vector.broadcast %cst_46 : f32 to vector<8x96xf32>
    %144 = arith.maximumf %142, %143 : vector<8x96xf32>
    %c2 = arith.constant 2 : index
    %c0_47 = arith.constant 0 : index
    %c0_48 = arith.constant 0 : index
    %145 = vector.load %arg2[%c2, %c0_47, %c0_48] : memref<7x96x96xf32, #tpu.memory_space<vmem>>, vector<1x96x96xf32>
    %146 = vector.shape_cast %145 : vector<1x96x96xf32> to vector<96x96xf32>
    %c2_49 = arith.constant 2 : index
    %c0_50 = arith.constant 0 : index
    %147 = vector.load %arg3[%c2_49, %c0_50] : memref<19x96xf32, #tpu.memory_space<vmem>>, vector<1x96xf32>
    %cst_51 = arith.constant dense<0.000000e+00> : vector<8x96xf32>
    %148 = tpu.matmul %144, %146, %cst_51 {dimension_numbers = #tpu.dot_dimension_numbers<[1], [0], [0], [1], [0, 0, 1, 1], [], []>} : vector<8x96xf32>, vector<96x96xf32>, vector<8x96xf32> -> vector<8x96xf32>
    %149 = vector.broadcast %147 : vector<1x96xf32> to vector<8x96xf32>
    %150 = arith.addf %148, %149 : vector<8x96xf32>
    %c9 = arith.constant 9 : index
    %c0_52 = arith.constant 0 : index
    %151 = vector.load %arg3[%c9, %c0_52] : memref<19x96xf32, #tpu.memory_space<vmem>>, vector<1x96xf32>
    %c15 = arith.constant 15 : index
    %c0_53 = arith.constant 0 : index
    %152 = vector.load %arg3[%c15, %c0_53] : memref<19x96xf32, #tpu.memory_space<vmem>>, vector<1x96xf32>
    %153 = vector.extract_strided_slice %150 {offsets = [0, 0], sizes = [8, 32], strides = [1, 1]} : vector<8x96xf32> to vector<8x32xf32>
    %cst_54 = arith.constant dense<0.000000e+00> : vector<8xf32>
    %154 = vector.multi_reduction <add>, %153, %cst_54 [1] : vector<8x32xf32> to vector<8xf32>
    %155 = vector.shape_cast %154 : vector<8xf32> to vector<8x1xf32>
    %cst_55 = arith.constant 3.200000e+01 : f32
    %156 = vector.broadcast %cst_55 : f32 to vector<8x1xf32>
    %157 = arith.divf %155, %156 : vector<8x1xf32>
    %158 = vector.broadcast %157 : vector<8x1xf32> to vector<8x32xf32>
    %159 = arith.subf %153, %158 : vector<8x32xf32>
    %160 = arith.mulf %159, %159 : vector<8x32xf32>
    %cst_56 = arith.constant dense<0.000000e+00> : vector<8xf32>
    %161 = vector.multi_reduction <add>, %160, %cst_56 [1] : vector<8x32xf32> to vector<8xf32>
    %162 = vector.shape_cast %161 : vector<8xf32> to vector<8x1xf32>
    %cst_57 = arith.constant 3.200000e+01 : f32
    %163 = vector.broadcast %cst_57 : f32 to vector<8x1xf32>
    %164 = arith.divf %162, %163 : vector<8x1xf32>
    %cst_58 = arith.constant 9.99999974E-6 : f32
    %165 = vector.broadcast %cst_58 : f32 to vector<8x1xf32>
    %166 = arith.addf %164, %165 : vector<8x1xf32>
    %167 = math.rsqrt %166 : vector<8x1xf32>
    %168 = vector.broadcast %157 : vector<8x1xf32> to vector<8x32xf32>
    %169 = arith.subf %153, %168 : vector<8x32xf32>
    %170 = vector.broadcast %167 : vector<8x1xf32> to vector<8x32xf32>
    %171 = arith.mulf %169, %170 : vector<8x32xf32>
    %172 = vector.extract_strided_slice %150 {offsets = [0, 32], sizes = [8, 32], strides = [1, 1]} : vector<8x96xf32> to vector<8x32xf32>
    %cst_59 = arith.constant dense<0.000000e+00> : vector<8xf32>
    %173 = vector.multi_reduction <add>, %172, %cst_59 [1] : vector<8x32xf32> to vector<8xf32>
    %174 = vector.shape_cast %173 : vector<8xf32> to vector<8x1xf32>
    %cst_60 = arith.constant 3.200000e+01 : f32
    %175 = vector.broadcast %cst_60 : f32 to vector<8x1xf32>
    %176 = arith.divf %174, %175 : vector<8x1xf32>
    %177 = vector.broadcast %176 : vector<8x1xf32> to vector<8x32xf32>
    %178 = arith.subf %172, %177 : vector<8x32xf32>
    %179 = arith.mulf %178, %178 : vector<8x32xf32>
    %cst_61 = arith.constant dense<0.000000e+00> : vector<8xf32>
    %180 = vector.multi_reduction <add>, %179, %cst_61 [1] : vector<8x32xf32> to vector<8xf32>
    %181 = vector.shape_cast %180 : vector<8xf32> to vector<8x1xf32>
    %cst_62 = arith.constant 3.200000e+01 : f32
    %182 = vector.broadcast %cst_62 : f32 to vector<8x1xf32>
    %183 = arith.divf %181, %182 : vector<8x1xf32>
    %cst_63 = arith.constant 9.99999974E-6 : f32
    %184 = vector.broadcast %cst_63 : f32 to vector<8x1xf32>
    %185 = arith.addf %183, %184 : vector<8x1xf32>
    %186 = math.rsqrt %185 : vector<8x1xf32>
    %187 = vector.broadcast %176 : vector<8x1xf32> to vector<8x32xf32>
    %188 = arith.subf %172, %187 : vector<8x32xf32>
    %189 = vector.broadcast %186 : vector<8x1xf32> to vector<8x32xf32>
    %190 = arith.mulf %188, %189 : vector<8x32xf32>
    %191 = vector.extract_strided_slice %150 {offsets = [0, 64], sizes = [8, 32], strides = [1, 1]} : vector<8x96xf32> to vector<8x32xf32>
    %cst_64 = arith.constant dense<0.000000e+00> : vector<8xf32>
    %192 = vector.multi_reduction <add>, %191, %cst_64 [1] : vector<8x32xf32> to vector<8xf32>
    %193 = vector.shape_cast %192 : vector<8xf32> to vector<8x1xf32>
    %cst_65 = arith.constant 3.200000e+01 : f32
    %194 = vector.broadcast %cst_65 : f32 to vector<8x1xf32>
    %195 = arith.divf %193, %194 : vector<8x1xf32>
    %196 = vector.broadcast %195 : vector<8x1xf32> to vector<8x32xf32>
    %197 = arith.subf %191, %196 : vector<8x32xf32>
    %198 = arith.mulf %197, %197 : vector<8x32xf32>
    %cst_66 = arith.constant dense<0.000000e+00> : vector<8xf32>
    %199 = vector.multi_reduction <add>, %198, %cst_66 [1] : vector<8x32xf32> to vector<8xf32>
    %200 = vector.shape_cast %199 : vector<8xf32> to vector<8x1xf32>
    %cst_67 = arith.constant 3.200000e+01 : f32
    %201 = vector.broadcast %cst_67 : f32 to vector<8x1xf32>
    %202 = arith.divf %200, %201 : vector<8x1xf32>
    %cst_68 = arith.constant 9.99999974E-6 : f32
    %203 = vector.broadcast %cst_68 : f32 to vector<8x1xf32>
    %204 = arith.addf %202, %203 : vector<8x1xf32>
    %205 = math.rsqrt %204 : vector<8x1xf32>
    %206 = vector.broadcast %195 : vector<8x1xf32> to vector<8x32xf32>
    %207 = arith.subf %191, %206 : vector<8x32xf32>
    %208 = vector.broadcast %205 : vector<8x1xf32> to vector<8x32xf32>
    %209 = arith.mulf %207, %208 : vector<8x32xf32>
    %210 = tpu.concatenate %171, %190, %209 in 1 : vector<8x32xf32>, vector<8x32xf32>, vector<8x32xf32> -> vector<8x96xf32>
    %211 = vector.broadcast %151 : vector<1x96xf32> to vector<8x96xf32>
    %212 = arith.mulf %210, %211 : vector<8x96xf32>
    %213 = vector.broadcast %152 : vector<1x96xf32> to vector<8x96xf32>
    %214 = arith.addf %212, %213 : vector<8x96xf32>
    %cst_69 = arith.constant 0.000000e+00 : f32
    %215 = vector.broadcast %cst_69 : f32 to vector<8x96xf32>
    %216 = arith.maximumf %214, %215 : vector<8x96xf32>
    %c3 = arith.constant 3 : index
    %c0_70 = arith.constant 0 : index
    %c0_71 = arith.constant 0 : index
    %217 = vector.load %arg2[%c3, %c0_70, %c0_71] : memref<7x96x96xf32, #tpu.memory_space<vmem>>, vector<1x96x96xf32>
    %218 = vector.shape_cast %217 : vector<1x96x96xf32> to vector<96x96xf32>
    %c3_72 = arith.constant 3 : index
    %c0_73 = arith.constant 0 : index
    %219 = vector.load %arg3[%c3_72, %c0_73] : memref<19x96xf32, #tpu.memory_space<vmem>>, vector<1x96xf32>
    %cst_74 = arith.constant dense<0.000000e+00> : vector<8x96xf32>
    %220 = tpu.matmul %216, %218, %cst_74 {dimension_numbers = #tpu.dot_dimension_numbers<[1], [0], [0], [1], [0, 0, 1, 1], [], []>} : vector<8x96xf32>, vector<96x96xf32>, vector<8x96xf32> -> vector<8x96xf32>
    %221 = vector.broadcast %219 : vector<1x96xf32> to vector<8x96xf32>
    %222 = arith.addf %220, %221 : vector<8x96xf32>
    %c10 = arith.constant 10 : index
    %c0_75 = arith.constant 0 : index
    %223 = vector.load %arg3[%c10, %c0_75] : memref<19x96xf32, #tpu.memory_space<vmem>>, vector<1x96xf32>
    %c16 = arith.constant 16 : index
    %c0_76 = arith.constant 0 : index
    %224 = vector.load %arg3[%c16, %c0_76] : memref<19x96xf32, #tpu.memory_space<vmem>>, vector<1x96xf32>
    %225 = vector.extract_strided_slice %222 {offsets = [0, 0], sizes = [8, 32], strides = [1, 1]} : vector<8x96xf32> to vector<8x32xf32>
    %cst_77 = arith.constant dense<0.000000e+00> : vector<8xf32>
    %226 = vector.multi_reduction <add>, %225, %cst_77 [1] : vector<8x32xf32> to vector<8xf32>
    %227 = vector.shape_cast %226 : vector<8xf32> to vector<8x1xf32>
    %cst_78 = arith.constant 3.200000e+01 : f32
    %228 = vector.broadcast %cst_78 : f32 to vector<8x1xf32>
    %229 = arith.divf %227, %228 : vector<8x1xf32>
    %230 = vector.broadcast %229 : vector<8x1xf32> to vector<8x32xf32>
    %231 = arith.subf %225, %230 : vector<8x32xf32>
    %232 = arith.mulf %231, %231 : vector<8x32xf32>
    %cst_79 = arith.constant dense<0.000000e+00> : vector<8xf32>
    %233 = vector.multi_reduction <add>, %232, %cst_79 [1] : vector<8x32xf32> to vector<8xf32>
    %234 = vector.shape_cast %233 : vector<8xf32> to vector<8x1xf32>
    %cst_80 = arith.constant 3.200000e+01 : f32
    %235 = vector.broadcast %cst_80 : f32 to vector<8x1xf32>
    %236 = arith.divf %234, %235 : vector<8x1xf32>
    %cst_81 = arith.constant 9.99999974E-6 : f32
    %237 = vector.broadcast %cst_81 : f32 to vector<8x1xf32>
    %238 = arith.addf %236, %237 : vector<8x1xf32>
    %239 = math.rsqrt %238 : vector<8x1xf32>
    %240 = vector.broadcast %229 : vector<8x1xf32> to vector<8x32xf32>
    %241 = arith.subf %225, %240 : vector<8x32xf32>
    %242 = vector.broadcast %239 : vector<8x1xf32> to vector<8x32xf32>
    %243 = arith.mulf %241, %242 : vector<8x32xf32>
    %244 = vector.extract_strided_slice %222 {offsets = [0, 32], sizes = [8, 32], strides = [1, 1]} : vector<8x96xf32> to vector<8x32xf32>
    %cst_82 = arith.constant dense<0.000000e+00> : vector<8xf32>
    %245 = vector.multi_reduction <add>, %244, %cst_82 [1] : vector<8x32xf32> to vector<8xf32>
    %246 = vector.shape_cast %245 : vector<8xf32> to vector<8x1xf32>
    %cst_83 = arith.constant 3.200000e+01 : f32
    %247 = vector.broadcast %cst_83 : f32 to vector<8x1xf32>
    %248 = arith.divf %246, %247 : vector<8x1xf32>
    %249 = vector.broadcast %248 : vector<8x1xf32> to vector<8x32xf32>
    %250 = arith.subf %244, %249 : vector<8x32xf32>
    %251 = arith.mulf %250, %250 : vector<8x32xf32>
    %cst_84 = arith.constant dense<0.000000e+00> : vector<8xf32>
    %252 = vector.multi_reduction <add>, %251, %cst_84 [1] : vector<8x32xf32> to vector<8xf32>
    %253 = vector.shape_cast %252 : vector<8xf32> to vector<8x1xf32>
    %cst_85 = arith.constant 3.200000e+01 : f32
    %254 = vector.broadcast %cst_85 : f32 to vector<8x1xf32>
    %255 = arith.divf %253, %254 : vector<8x1xf32>
    %cst_86 = arith.constant 9.99999974E-6 : f32
    %256 = vector.broadcast %cst_86 : f32 to vector<8x1xf32>
    %257 = arith.addf %255, %256 : vector<8x1xf32>
    %258 = math.rsqrt %257 : vector<8x1xf32>
    %259 = vector.broadcast %248 : vector<8x1xf32> to vector<8x32xf32>
    %260 = arith.subf %244, %259 : vector<8x32xf32>
    %261 = vector.broadcast %258 : vector<8x1xf32> to vector<8x32xf32>
    %262 = arith.mulf %260, %261 : vector<8x32xf32>
    %263 = vector.extract_strided_slice %222 {offsets = [0, 64], sizes = [8, 32], strides = [1, 1]} : vector<8x96xf32> to vector<8x32xf32>
    %cst_87 = arith.constant dense<0.000000e+00> : vector<8xf32>
    %264 = vector.multi_reduction <add>, %263, %cst_87 [1] : vector<8x32xf32> to vector<8xf32>
    %265 = vector.shape_cast %264 : vector<8xf32> to vector<8x1xf32>
    %cst_88 = arith.constant 3.200000e+01 : f32
    %266 = vector.broadcast %cst_88 : f32 to vector<8x1xf32>
    %267 = arith.divf %265, %266 : vector<8x1xf32>
    %268 = vector.broadcast %267 : vector<8x1xf32> to vector<8x32xf32>
    %269 = arith.subf %263, %268 : vector<8x32xf32>
    %270 = arith.mulf %269, %269 : vector<8x32xf32>
    %cst_89 = arith.constant dense<0.000000e+00> : vector<8xf32>
    %271 = vector.multi_reduction <add>, %270, %cst_89 [1] : vector<8x32xf32> to vector<8xf32>
    %272 = vector.shape_cast %271 : vector<8xf32> to vector<8x1xf32>
    %cst_90 = arith.constant 3.200000e+01 : f32
    %273 = vector.broadcast %cst_90 : f32 to vector<8x1xf32>
    %274 = arith.divf %272, %273 : vector<8x1xf32>
    %cst_91 = arith.constant 9.99999974E-6 : f32
    %275 = vector.broadcast %cst_91 : f32 to vector<8x1xf32>
    %276 = arith.addf %274, %275 : vector<8x1xf32>
    %277 = math.rsqrt %276 : vector<8x1xf32>
    %278 = vector.broadcast %267 : vector<8x1xf32> to vector<8x32xf32>
    %279 = arith.subf %263, %278 : vector<8x32xf32>
    %280 = vector.broadcast %277 : vector<8x1xf32> to vector<8x32xf32>
    %281 = arith.mulf %279, %280 : vector<8x32xf32>
    %282 = tpu.concatenate %243, %262, %281 in 1 : vector<8x32xf32>, vector<8x32xf32>, vector<8x32xf32> -> vector<8x96xf32>
    %283 = vector.broadcast %223 : vector<1x96xf32> to vector<8x96xf32>
    %284 = arith.mulf %282, %283 : vector<8x96xf32>
    %285 = vector.broadcast %224 : vector<1x96xf32> to vector<8x96xf32>
    %286 = arith.addf %284, %285 : vector<8x96xf32>
    %cst_92 = arith.constant 0.000000e+00 : f32
    %287 = vector.broadcast %cst_92 : f32 to vector<8x96xf32>
    %288 = arith.maximumf %286, %287 : vector<8x96xf32>
    %c4 = arith.constant 4 : index
    %c0_93 = arith.constant 0 : index
    %c0_94 = arith.constant 0 : index
    %289 = vector.load %arg2[%c4, %c0_93, %c0_94] : memref<7x96x96xf32, #tpu.memory_space<vmem>>, vector<1x96x96xf32>
    %290 = vector.shape_cast %289 : vector<1x96x96xf32> to vector<96x96xf32>
    %c4_95 = arith.constant 4 : index
    %c0_96 = arith.constant 0 : index
    %291 = vector.load %arg3[%c4_95, %c0_96] : memref<19x96xf32, #tpu.memory_space<vmem>>, vector<1x96xf32>
    %cst_97 = arith.constant dense<0.000000e+00> : vector<8x96xf32>
    %292 = tpu.matmul %288, %290, %cst_97 {dimension_numbers = #tpu.dot_dimension_numbers<[1], [0], [0], [1], [0, 0, 1, 1], [], []>} : vector<8x96xf32>, vector<96x96xf32>, vector<8x96xf32> -> vector<8x96xf32>
    %293 = vector.broadcast %291 : vector<1x96xf32> to vector<8x96xf32>
    %294 = arith.addf %292, %293 : vector<8x96xf32>
    %c11 = arith.constant 11 : index
    %c0_98 = arith.constant 0 : index
    %295 = vector.load %arg3[%c11, %c0_98] : memref<19x96xf32, #tpu.memory_space<vmem>>, vector<1x96xf32>
    %c17 = arith.constant 17 : index
    %c0_99 = arith.constant 0 : index
    %296 = vector.load %arg3[%c17, %c0_99] : memref<19x96xf32, #tpu.memory_space<vmem>>, vector<1x96xf32>
    %297 = vector.extract_strided_slice %294 {offsets = [0, 0], sizes = [8, 32], strides = [1, 1]} : vector<8x96xf32> to vector<8x32xf32>
    %298 = vector.extract_strided_slice %297 {offsets = [0, 0], sizes = [8, 16], strides = [1, 1]} : vector<8x32xf32> to vector<8x16xf32>
    %cst_100 = arith.constant dense<0.000000e+00> : vector<8xf32>
    %299 = vector.multi_reduction <add>, %298, %cst_100 [1] : vector<8x16xf32> to vector<8xf32>
    %300 = vector.shape_cast %299 : vector<8xf32> to vector<8x1xf32>
    %cst_101 = arith.constant 1.600000e+01 : f32
    %301 = vector.broadcast %cst_101 : f32 to vector<8x1xf32>
    %302 = arith.divf %300, %301 : vector<8x1xf32>
    %303 = vector.broadcast %302 : vector<8x1xf32> to vector<8x16xf32>
    %304 = arith.subf %298, %303 : vector<8x16xf32>
    %305 = arith.mulf %304, %304 : vector<8x16xf32>
    %cst_102 = arith.constant dense<0.000000e+00> : vector<8xf32>
    %306 = vector.multi_reduction <add>, %305, %cst_102 [1] : vector<8x16xf32> to vector<8xf32>
    %307 = vector.shape_cast %306 : vector<8xf32> to vector<8x1xf32>
    %cst_103 = arith.constant 1.600000e+01 : f32
    %308 = vector.broadcast %cst_103 : f32 to vector<8x1xf32>
    %309 = arith.divf %307, %308 : vector<8x1xf32>
    %cst_104 = arith.constant 9.99999974E-6 : f32
    %310 = vector.broadcast %cst_104 : f32 to vector<8x1xf32>
    %311 = arith.addf %309, %310 : vector<8x1xf32>
    %312 = math.rsqrt %311 : vector<8x1xf32>
    %313 = vector.broadcast %302 : vector<8x1xf32> to vector<8x32xf32>
    %314 = arith.subf %297, %313 : vector<8x32xf32>
    %315 = vector.broadcast %312 : vector<8x1xf32> to vector<8x32xf32>
    %316 = arith.mulf %314, %315 : vector<8x32xf32>
    %317 = vector.extract_strided_slice %294 {offsets = [0, 32], sizes = [8, 32], strides = [1, 1]} : vector<8x96xf32> to vector<8x32xf32>
    %318 = vector.extract_strided_slice %317 {offsets = [0, 0], sizes = [8, 16], strides = [1, 1]} : vector<8x32xf32> to vector<8x16xf32>
    %cst_105 = arith.constant dense<0.000000e+00> : vector<8xf32>
    %319 = vector.multi_reduction <add>, %318, %cst_105 [1] : vector<8x16xf32> to vector<8xf32>
    %320 = vector.shape_cast %319 : vector<8xf32> to vector<8x1xf32>
    %cst_106 = arith.constant 1.600000e+01 : f32
    %321 = vector.broadcast %cst_106 : f32 to vector<8x1xf32>
    %322 = arith.divf %320, %321 : vector<8x1xf32>
    %323 = vector.broadcast %322 : vector<8x1xf32> to vector<8x16xf32>
    %324 = arith.subf %318, %323 : vector<8x16xf32>
    %325 = arith.mulf %324, %324 : vector<8x16xf32>
    %cst_107 = arith.constant dense<0.000000e+00> : vector<8xf32>
    %326 = vector.multi_reduction <add>, %325, %cst_107 [1] : vector<8x16xf32> to vector<8xf32>
    %327 = vector.shape_cast %326 : vector<8xf32> to vector<8x1xf32>
    %cst_108 = arith.constant 1.600000e+01 : f32
    %328 = vector.broadcast %cst_108 : f32 to vector<8x1xf32>
    %329 = arith.divf %327, %328 : vector<8x1xf32>
    %cst_109 = arith.constant 9.99999974E-6 : f32
    %330 = vector.broadcast %cst_109 : f32 to vector<8x1xf32>
    %331 = arith.addf %329, %330 : vector<8x1xf32>
    %332 = math.rsqrt %331 : vector<8x1xf32>
    %333 = vector.broadcast %322 : vector<8x1xf32> to vector<8x32xf32>
    %334 = arith.subf %317, %333 : vector<8x32xf32>
    %335 = vector.broadcast %332 : vector<8x1xf32> to vector<8x32xf32>
    %336 = arith.mulf %334, %335 : vector<8x32xf32>
    %337 = vector.extract_strided_slice %294 {offsets = [0, 64], sizes = [8, 32], strides = [1, 1]} : vector<8x96xf32> to vector<8x32xf32>
    %338 = vector.extract_strided_slice %337 {offsets = [0, 0], sizes = [8, 16], strides = [1, 1]} : vector<8x32xf32> to vector<8x16xf32>
    %cst_110 = arith.constant dense<0.000000e+00> : vector<8xf32>
    %339 = vector.multi_reduction <add>, %338, %cst_110 [1] : vector<8x16xf32> to vector<8xf32>
    %340 = vector.shape_cast %339 : vector<8xf32> to vector<8x1xf32>
    %cst_111 = arith.constant 1.600000e+01 : f32
    %341 = vector.broadcast %cst_111 : f32 to vector<8x1xf32>
    %342 = arith.divf %340, %341 : vector<8x1xf32>
    %343 = vector.broadcast %342 : vector<8x1xf32> to vector<8x16xf32>
    %344 = arith.subf %338, %343 : vector<8x16xf32>
    %345 = arith.mulf %344, %344 : vector<8x16xf32>
    %cst_112 = arith.constant dense<0.000000e+00> : vector<8xf32>
    %346 = vector.multi_reduction <add>, %345, %cst_112 [1] : vector<8x16xf32> to vector<8xf32>
    %347 = vector.shape_cast %346 : vector<8xf32> to vector<8x1xf32>
    %cst_113 = arith.constant 1.600000e+01 : f32
    %348 = vector.broadcast %cst_113 : f32 to vector<8x1xf32>
    %349 = arith.divf %347, %348 : vector<8x1xf32>
    %cst_114 = arith.constant 9.99999974E-6 : f32
    %350 = vector.broadcast %cst_114 : f32 to vector<8x1xf32>
    %351 = arith.addf %349, %350 : vector<8x1xf32>
    %352 = math.rsqrt %351 : vector<8x1xf32>
    %353 = vector.broadcast %342 : vector<8x1xf32> to vector<8x32xf32>
    %354 = arith.subf %337, %353 : vector<8x32xf32>
    %355 = vector.broadcast %352 : vector<8x1xf32> to vector<8x32xf32>
    %356 = arith.mulf %354, %355 : vector<8x32xf32>
    %357 = tpu.concatenate %316, %336, %356 in 1 : vector<8x32xf32>, vector<8x32xf32>, vector<8x32xf32> -> vector<8x96xf32>
    %358 = vector.broadcast %295 : vector<1x96xf32> to vector<8x96xf32>
    %359 = arith.mulf %357, %358 : vector<8x96xf32>
    %360 = vector.broadcast %296 : vector<1x96xf32> to vector<8x96xf32>
    %361 = arith.addf %359, %360 : vector<8x96xf32>
    %cst_115 = arith.constant 0.000000e+00 : f32
    %362 = vector.broadcast %cst_115 : f32 to vector<8x96xf32>
    %363 = arith.maximumf %361, %362 : vector<8x96xf32>
    %c5 = arith.constant 5 : index
    %c0_116 = arith.constant 0 : index
    %c0_117 = arith.constant 0 : index
    %364 = vector.load %arg2[%c5, %c0_116, %c0_117] : memref<7x96x96xf32, #tpu.memory_space<vmem>>, vector<1x96x96xf32>
    %365 = vector.shape_cast %364 : vector<1x96x96xf32> to vector<96x96xf32>
    %c5_118 = arith.constant 5 : index
    %c0_119 = arith.constant 0 : index
    %366 = vector.load %arg3[%c5_118, %c0_119] : memref<19x96xf32, #tpu.memory_space<vmem>>, vector<1x96xf32>
    %cst_120 = arith.constant dense<0.000000e+00> : vector<8x96xf32>
    %367 = tpu.matmul %363, %365, %cst_120 {dimension_numbers = #tpu.dot_dimension_numbers<[1], [0], [0], [1], [0, 0, 1, 1], [], []>} : vector<8x96xf32>, vector<96x96xf32>, vector<8x96xf32> -> vector<8x96xf32>
    %368 = vector.broadcast %366 : vector<1x96xf32> to vector<8x96xf32>
    %369 = arith.addf %367, %368 : vector<8x96xf32>
    %c12 = arith.constant 12 : index
    %c0_121 = arith.constant 0 : index
    %370 = vector.load %arg3[%c12, %c0_121] : memref<19x96xf32, #tpu.memory_space<vmem>>, vector<1x96xf32>
    %c18 = arith.constant 18 : index
    %c0_122 = arith.constant 0 : index
    %371 = vector.load %arg3[%c18, %c0_122] : memref<19x96xf32, #tpu.memory_space<vmem>>, vector<1x96xf32>
    %372 = vector.extract_strided_slice %369 {offsets = [0, 0], sizes = [8, 32], strides = [1, 1]} : vector<8x96xf32> to vector<8x32xf32>
    %373 = vector.extract_strided_slice %372 {offsets = [0, 0], sizes = [8, 8], strides = [1, 1]} : vector<8x32xf32> to vector<8x8xf32>
    %cst_123 = arith.constant dense<0.000000e+00> : vector<8xf32>
    %374 = vector.multi_reduction <add>, %373, %cst_123 [1] : vector<8x8xf32> to vector<8xf32>
    %375 = vector.shape_cast %374 : vector<8xf32> to vector<8x1xf32>
    %cst_124 = arith.constant 8.000000e+00 : f32
    %376 = vector.broadcast %cst_124 : f32 to vector<8x1xf32>
    %377 = arith.divf %375, %376 : vector<8x1xf32>
    %378 = vector.broadcast %377 : vector<8x1xf32> to vector<8x8xf32>
    %379 = arith.subf %373, %378 : vector<8x8xf32>
    %380 = arith.mulf %379, %379 : vector<8x8xf32>
    %cst_125 = arith.constant dense<0.000000e+00> : vector<8xf32>
    %381 = vector.multi_reduction <add>, %380, %cst_125 [1] : vector<8x8xf32> to vector<8xf32>
    %382 = vector.shape_cast %381 : vector<8xf32> to vector<8x1xf32>
    %cst_126 = arith.constant 8.000000e+00 : f32
    %383 = vector.broadcast %cst_126 : f32 to vector<8x1xf32>
    %384 = arith.divf %382, %383 : vector<8x1xf32>
    %cst_127 = arith.constant 9.99999974E-6 : f32
    %385 = vector.broadcast %cst_127 : f32 to vector<8x1xf32>
    %386 = arith.addf %384, %385 : vector<8x1xf32>
    %387 = math.rsqrt %386 : vector<8x1xf32>
    %388 = vector.broadcast %377 : vector<8x1xf32> to vector<8x32xf32>
    %389 = arith.subf %372, %388 : vector<8x32xf32>
    %390 = vector.broadcast %387 : vector<8x1xf32> to vector<8x32xf32>
    %391 = arith.mulf %389, %390 : vector<8x32xf32>
    %392 = vector.extract_strided_slice %369 {offsets = [0, 32], sizes = [8, 32], strides = [1, 1]} : vector<8x96xf32> to vector<8x32xf32>
    %393 = vector.extract_strided_slice %392 {offsets = [0, 0], sizes = [8, 8], strides = [1, 1]} : vector<8x32xf32> to vector<8x8xf32>
    %cst_128 = arith.constant dense<0.000000e+00> : vector<8xf32>
    %394 = vector.multi_reduction <add>, %393, %cst_128 [1] : vector<8x8xf32> to vector<8xf32>
    %395 = vector.shape_cast %394 : vector<8xf32> to vector<8x1xf32>
    %cst_129 = arith.constant 8.000000e+00 : f32
    %396 = vector.broadcast %cst_129 : f32 to vector<8x1xf32>
    %397 = arith.divf %395, %396 : vector<8x1xf32>
    %398 = vector.broadcast %397 : vector<8x1xf32> to vector<8x8xf32>
    %399 = arith.subf %393, %398 : vector<8x8xf32>
    %400 = arith.mulf %399, %399 : vector<8x8xf32>
    %cst_130 = arith.constant dense<0.000000e+00> : vector<8xf32>
    %401 = vector.multi_reduction <add>, %400, %cst_130 [1] : vector<8x8xf32> to vector<8xf32>
    %402 = vector.shape_cast %401 : vector<8xf32> to vector<8x1xf32>
    %cst_131 = arith.constant 8.000000e+00 : f32
    %403 = vector.broadcast %cst_131 : f32 to vector<8x1xf32>
    %404 = arith.divf %402, %403 : vector<8x1xf32>
    %cst_132 = arith.constant 9.99999974E-6 : f32
    %405 = vector.broadcast %cst_132 : f32 to vector<8x1xf32>
    %406 = arith.addf %404, %405 : vector<8x1xf32>
    %407 = math.rsqrt %406 : vector<8x1xf32>
    %408 = vector.broadcast %397 : vector<8x1xf32> to vector<8x32xf32>
    %409 = arith.subf %392, %408 : vector<8x32xf32>
    %410 = vector.broadcast %407 : vector<8x1xf32> to vector<8x32xf32>
    %411 = arith.mulf %409, %410 : vector<8x32xf32>
    %412 = vector.extract_strided_slice %369 {offsets = [0, 64], sizes = [8, 32], strides = [1, 1]} : vector<8x96xf32> to vector<8x32xf32>
    %413 = vector.extract_strided_slice %412 {offsets = [0, 0], sizes = [8, 8], strides = [1, 1]} : vector<8x32xf32> to vector<8x8xf32>
    %cst_133 = arith.constant dense<0.000000e+00> : vector<8xf32>
    %414 = vector.multi_reduction <add>, %413, %cst_133 [1] : vector<8x8xf32> to vector<8xf32>
    %415 = vector.shape_cast %414 : vector<8xf32> to vector<8x1xf32>
    %cst_134 = arith.constant 8.000000e+00 : f32
    %416 = vector.broadcast %cst_134 : f32 to vector<8x1xf32>
    %417 = arith.divf %415, %416 : vector<8x1xf32>
    %418 = vector.broadcast %417 : vector<8x1xf32> to vector<8x8xf32>
    %419 = arith.subf %413, %418 : vector<8x8xf32>
    %420 = arith.mulf %419, %419 : vector<8x8xf32>
    %cst_135 = arith.constant dense<0.000000e+00> : vector<8xf32>
    %421 = vector.multi_reduction <add>, %420, %cst_135 [1] : vector<8x8xf32> to vector<8xf32>
    %422 = vector.shape_cast %421 : vector<8xf32> to vector<8x1xf32>
    %cst_136 = arith.constant 8.000000e+00 : f32
    %423 = vector.broadcast %cst_136 : f32 to vector<8x1xf32>
    %424 = arith.divf %422, %423 : vector<8x1xf32>
    %cst_137 = arith.constant 9.99999974E-6 : f32
    %425 = vector.broadcast %cst_137 : f32 to vector<8x1xf32>
    %426 = arith.addf %424, %425 : vector<8x1xf32>
    %427 = math.rsqrt %426 : vector<8x1xf32>
    %428 = vector.broadcast %417 : vector<8x1xf32> to vector<8x32xf32>
    %429 = arith.subf %412, %428 : vector<8x32xf32>
    %430 = vector.broadcast %427 : vector<8x1xf32> to vector<8x32xf32>
    %431 = arith.mulf %429, %430 : vector<8x32xf32>
    %432 = tpu.concatenate %391, %411, %431 in 1 : vector<8x32xf32>, vector<8x32xf32>, vector<8x32xf32> -> vector<8x96xf32>
    %433 = vector.broadcast %370 : vector<1x96xf32> to vector<8x96xf32>
    %434 = arith.mulf %432, %433 : vector<8x96xf32>
    %435 = vector.broadcast %371 : vector<1x96xf32> to vector<8x96xf32>
    %436 = arith.addf %434, %435 : vector<8x96xf32>
    %cst_138 = arith.constant 0.000000e+00 : f32
    %437 = vector.broadcast %cst_138 : f32 to vector<8x96xf32>
    %438 = arith.maximumf %436, %437 : vector<8x96xf32>
    %c6 = arith.constant 6 : index
    %c0_139 = arith.constant 0 : index
    %c0_140 = arith.constant 0 : index
    %439 = vector.load %arg2[%c6, %c0_139, %c0_140] : memref<7x96x96xf32, #tpu.memory_space<vmem>>, vector<1x96x96xf32>
    %440 = vector.shape_cast %439 : vector<1x96x96xf32> to vector<96x96xf32>
    %c6_141 = arith.constant 6 : index
    %c0_142 = arith.constant 0 : index
    %441 = vector.load %arg3[%c6_141, %c0_142] : memref<19x96xf32, #tpu.memory_space<vmem>>, vector<1x96xf32>
    %cst_143 = arith.constant dense<0.000000e+00> : vector<8x96xf32>
    %442 = tpu.matmul %438, %440, %cst_143 {dimension_numbers = #tpu.dot_dimension_numbers<[1], [0], [0], [1], [0, 0, 1, 1], [], []>} : vector<8x96xf32>, vector<96x96xf32>, vector<8x96xf32> -> vector<8x96xf32>
    %443 = vector.broadcast %441 : vector<1x96xf32> to vector<8x96xf32>
    %444 = arith.addf %442, %443 : vector<8x96xf32>
    %445 = vector.extract_strided_slice %444 {offsets = [0, 0], sizes = [8, 1], strides = [1, 1]} : vector<8x96xf32> to vector<8x1xf32>
    %c0_144 = arith.constant 0 : index
    %c0_145 = arith.constant 0 : index
    %446 = vector.load %arg4[%c0_144, %c0_145] : memref<8x1xf32, #tpu.memory_space<vmem>>, vector<8x1xf32>
    tpu.vector_store %arg4[%c0_144, %c0_145], %445 {strides = array<i32>} : memref<8x1xf32, #tpu.memory_space<vmem>>, vector<8x1xf32>,
    return
  }
  func.func @transform_0(%arg0: i32) -> (i32, i32) {
    %c0_i32 = arith.constant 0 : i32
    %c0_i32_0 = arith.constant 0 : i32
    return %arg0, %c0_i32 : i32, i32
  }
  func.func @transform_1(%arg0: i32) -> (i32, i32, i32) {
    %c0_i32 = arith.constant 0 : i32
    %c0_i32_0 = arith.constant 0 : i32
    %c0_i32_1 = arith.constant 0 : i32
    %c0_i32_2 = arith.constant 0 : i32
    return %c0_i32, %c0_i32_0, %c0_i32_1 : i32, i32, i32
  }
  func.func @transform_2(%arg0: i32) -> (i32, i32) {
    %c0_i32 = arith.constant 0 : i32
    %c0_i32_0 = arith.constant 0 : i32
    %c0_i32_1 = arith.constant 0 : i32
    return %c0_i32, %c0_i32_0 : i32, i32
  }
  func.func @transform_3(%arg0: i32) -> (i32, i32) {
    %c0_i32 = arith.constant 0 : i32
    %c0_i32_0 = arith.constant 0 : i32
    return %arg0, %c0_i32 : i32, i32
  }
}

</mosaic_0001>

<bundles_post_ra>
// kernel: tpu_custom_call.1
= control target key start
LH: loop header
LB: loop body
LE: loop exit
PB: predicated region body
PF: predicated region fallthrough
CT: control target
= control target key end

     0   :  { %8 = vsyncpa [#allocation3], 0  ;;  %s1813_s0 = inlined_call_operand.hbm [shape: f32[8,96], index: 0, kind: input, shape index: {}]   ;;  %s1814_s1 = inlined_call_operand.hbm [shape: f32[7,96,96], index: 1, kind: input, shape index: {}]   ;;  %s1815_s2 = inlined_call_operand.hbm [shape: f32[19,96], index: 2, kind: input, shape index: {}]   ;;  %s1816_s3 = inlined_call_operand.vmem [shape: f32[8,1], index: 3, kind: output, shape index: {}]  }
   0x1   :  { %9 = vsyncpa [#allocation5], 0  ;;  %s1535_s12 = smov [#allocation4]  }
   0x2   :  { %s25_s13 = sshll.u32 %s1535_s12, 4  ;;  %s26_s13 = int_to_ptr.vmem [resolvable:$true] %s25_s13 }
   0x3   :  { %s1479_s14 = scalar_lea.vmem %s26_s13, 10752  ;;  %p1484_p1 = scmp.lt.s32.totalorder %s26_s13, %s26_s13 }
   0x4   :  { %p1480_p0 = scmp.ne.s32.totalorder %s26_s13, %s1479_s14  ;;  %p1485_p2 = scmp.lt.s32.totalorder %s1479_s14, %s1479_s14 }
   0x6   :  { %p1486_p3 = por %p1485_p2, %p1484_p1 }
   0x8   :  { %p1487_p4 = pnand %p1486_p3, %p1480_p0 }
   0xa   :  { %1490 = shalt.err (!%p1487_p4)
}
   0xb   :  { %s1536_s15 = smov 128   ;;  %s1537_s16 = smov 8  }
   0xc   :  { %31 = dma.hbm_to_vmem [thread:$0]  %s1814_s1, 10752, %s26_s13, [#allocation5], %s1536_s15, %s1536_s15, %s1537_s16  }
   0xd   :  { %s1538_s19 = smov [#allocation2]   ;;  %s1539_s21 = smov [#allocation6]  }
   0xe   :  { %s16_s20 = sshll.u32 %s1538_s19, 4  ;;  %s37_s22 = sshll.u32 %s1539_s21, 4  ;;  %s17_s20 = int_to_ptr.vmem [resolvable:$true] %s16_s20  ;;  %s38_s22 = int_to_ptr.vmem [resolvable:$true] %s37_s22 }
   0xf   :  { %s1499_s23 = scalar_lea.vmem %s17_s20, 128  ;;  %p1504_p6 = scmp.lt.s32.totalorder %s17_s20, %s17_s20 }
  0x10   :  { %p1500_p5 = scmp.ne.s32.totalorder %s17_s20, %s1499_s23  ;;  %p1505_p7 = scmp.lt.s32.totalorder %s1499_s23, %s1499_s23 }
  0x12   :  { %p1506_p8 = por %p1505_p7, %p1504_p6 }
  0x14   :  { %p1507_p9 = pnand %p1506_p8, %p1500_p5 }
  0x16   :  { %1510 = shalt.err (!%p1507_p9)
}
  0x17   :  { %19 = dma.hbm_to_vmem [thread:$0]  %s1813_s0, 128, %s17_s20, [#allocation3]  }
  0x18   :  { %s1519_s26 = scalar_lea.vmem %s38_s22, 384  ;;  %p1524_p11 = scmp.lt.s32.totalorder %s38_s22, %s38_s22 }
  0x19   :  { %p1520_p10 = scmp.ne.s32.totalorder %s38_s22, %s1519_s26  ;;  %p1525_p12 = scmp.lt.s32.totalorder %s1519_s26, %s1519_s26 }
  0x1b   :  { %p1526_p13 = por %p1525_p12, %p1524_p11 }
  0x1d   :  { %p1527_p0 = pnand %p1526_p13, %p1520_p10 }
  0x1f   :  { %1530 = shalt.err (!%p1527_p0)
}
  0x20   :  { %43 = dma.hbm_to_vmem [thread:$0]  %s1815_s2, 384, %s38_s22, [#allocation5], %s1536_s15, %s1536_s15, %s1537_s16  }
  0x21   :  { %1531 = dma.done.wait [#allocation3], 128  }
  0x22   :  { %1532 = vsyncadd [#allocation3], 4294967168 }
  0x23   :  { %1533 = dma.done.wait [#allocation5], 11136  }
  0x24   :  { %1534 = vsyncadd [#allocation5], 4294956160  ;;  %v1540_v0 = vmov 0.0   ;;  %vm1541_vm0 = vmmov 0   ;;  %v65_v1 = vld [vmem:[#allocation4 + $0x58] sm:$0xff]  ;;  %v64_v2 = vld [vmem:[#allocation4 + $0x50] sm:$0xff] }
  0x25   :  { %1237 = vmatprep.subr.mxu0 %v1540_v0  ;;  %1261 = vmatprep.mubr.msk.f32.mxu0 %vm1541_vm0, %v1540_v0  ;;  %v63_v3 = vld [vmem:[#allocation4 + $0x48] sm:$0xff]  ;;  %v62_v4 = vld [vmem:[#allocation4 + $0x40] sm:$0xff]  ;;  %v61_v5 = vld [vmem:[#allocation4 + $0x38] sm:$0xff]  ;;  %vm71_vm1 = vcmask 785408   ;;  %s1542_s0 = smov 96   ;;  %s1543_s2 = smov 64  }
  0x26   :  { %1264 = vmatprep.subr.mxu1 %v1540_v0  ;;  %1288 = vmatprep.mubr.msk.f32.mxu1 %vm1541_vm0, %v1540_v0  ;;  %v60_v6 = vld [vmem:[#allocation4 + $0x30] sm:$0xff]  ;;  %v59_v7 = vld [vmem:[#allocation4 + $0x28] sm:$0xff]  ;;  %v58_v8 = vld [vmem:[#allocation4 + $0x20] sm:$0xff]  ;;  %vm147_vm2 = vcmask 261120   ;;  %vm204_vm3 = vcmask 523264   ;;  %vm790_vm4 = vcmask 130048  }
  0x27   :  { %1238 = vmatpush3.msra.mxu0 %v65_v1  ;;  %v57_v9 = vld [vmem:[#allocation4 + $0x18] sm:$0xff]  ;;  %v56_v10 = vld [vmem:[#allocation4 + $0x10] sm:$0xff]  ;;  %v55_v11 = vld [vmem:[#allocation4 + $0x8] sm:$0xff]  ;;  %vm952_vm5 = vcmask 64512   ;;  %vm1112_vm6 = vcmask 7168  }
  0x28   :  { %1239 = vmatprep.subr.mxu0 %v1540_v0  ;;  %v54_v12 = vld [vmem:[#allocation4] sm:$0xff]  ;;  %v53_v13 = vld [vmem:[#allocation2] sm:$0xff]  ;;  %v228_v41 = vld [vmem:[#allocation4 + $0xb0] sm:$0xff] }
  0x29   :  { %1240 = vmatpush3.msra.mxu0 %v64_v2  ;;  %v1120_v14 = vld [vmem:[#allocation6] ss:$0 sm:$0xff]  ;;  %v229_v40 = vld [vmem:[#allocation4 + $0xb8] sm:$0xff]  ;;  %v227_v42 = vld [vmem:[#allocation4 + $0xa8] sm:$0xff] }
  0x2a   :  { %1241 = vmatprep.subr.mxu0 %v1540_v0  ;;  %1265 = vmatpush3.msra.mxu1 %v229_v40  ;;  %v226_v43 = vld [vmem:[#allocation4 + $0xa0] sm:$0xff]  ;;  %v225_v44 = vld [vmem:[#allocation4 + $0x98] sm:$0xff]  ;;  %v224_v45 = vld [vmem:[#allocation4 + $0x90] sm:$0xff] }
  0x2b   :  { %1242 = vmatpush3.msra.mxu0 %v63_v3  ;;  %1266 = vmatprep.subr.mxu1 %v1540_v0  ;;  %v223_v46 = vld [vmem:[#allocation4 + $0x88] sm:$0xff]  ;;  %v222_v47 = vld [vmem:[#allocation4 + $0x80] sm:$0xff]  ;;  %v221_v48 = vld [vmem:[#allocation4 + $0x78] sm:$0xff] }
  0x2c   :  { %1243 = vmatprep.subr.mxu0 %v1540_v0  ;;  %1267 = vmatpush3.msra.mxu1 %v228_v41  ;;  %v220_v49 = vld [vmem:[#allocation4 + $0x70] sm:$0xff]  ;;  %v219_v50 = vld [vmem:[#allocation4 + $0x68] sm:$0xff]  ;;  %v218_v51 = vld [vmem:[#allocation4 + $0x60] sm:$0xff] }
  0x2d   :  { %1244 = vmatpush3.msra.mxu0 %v62_v4  ;;  %1268 = vmatprep.subr.mxu1 %v1540_v0  ;;  %v1122_v3 = vld [vmem:[#allocation6 + $0x7] ss:$0 sm:$0xff]  ;;  %v385_v41 = vld [vmem:[#allocation4 + $0xf8] sm:$0xff] }
  0x2e   :  { %1245 = vmatprep.subr.mxu0 %v1540_v0  ;;  %1269 = vmatpush3.msra.mxu1 %v227_v42  ;;  %v386_v40 = vld [vmem:[#allocation4 + $0x100] sm:$0xff]  ;;  %v384_v42 = vld [vmem:[#allocation4 + $0xf0] sm:$0xff] }
  0x2f   :  { %1246 = vmatpush3.msra.mxu0 %v61_v5  ;;  %1270 = vmatprep.subr.mxu1 %v1540_v0 }
  0x30   :  { %1247 = vmatprep.subr.mxu0 %v1540_v0  ;;  %1271 = vmatpush3.msra.mxu1 %v226_v43  ;;  %v383_v43 = vld [vmem:[#allocation4 + $0xe8] sm:$0xff] }
  0x31   :  { %1248 = vmatpush3.msra.mxu0 %v60_v6  ;;  %1272 = vmatprep.subr.mxu1 %v1540_v0  ;;  %v1123_v6 = vld [vmem:[#allocation6 + $0xd] ss:$0 sm:$0xff] }
  0x32   :  { %1249 = vmatprep.subr.mxu0 %v1540_v0  ;;  %1273 = vmatpush3.msra.mxu1 %v225_v44  ;;  %v382_v44 = vld [vmem:[#allocation4 + $0xe0] sm:$0xff] }
  0x33   :  { %1250 = vmatpush3.msra.mxu0 %v59_v7  ;;  %1274 = vmatprep.subr.mxu1 %v1540_v0 }
  0x34   :  { %1251 = vmatprep.subr.mxu0 %v1540_v0  ;;  %1275 = vmatpush3.msra.mxu1 %v224_v45  ;;  %v381_v45 = vld [vmem:[#allocation4 + $0xd8] sm:$0xff] }
  0x35   :  { %1252 = vmatpush3.msra.mxu0 %v58_v8  ;;  %1276 = vmatprep.subr.mxu1 %v1540_v0 }
  0x36   :  { %1253 = vmatprep.subr.mxu0 %v1540_v0  ;;  %1277 = vmatpush3.msra.mxu1 %v223_v46  ;;  %v380_v46 = vld [vmem:[#allocation4 + $0xd0] sm:$0xff] }
  0x37   :  { %1254 = vmatpush3.msra.mxu0 %v57_v9  ;;  %1278 = vmatprep.subr.mxu1 %v1540_v0 }
  0x38   :  { %1255 = vmatprep.subr.mxu0 %v1540_v0  ;;  %1279 = vmatpush3.msra.mxu1 %v222_v47  ;;  %v379_v47 = vld [vmem:[#allocation4 + $0xc8] sm:$0xff] }
  0x39   :  { %1256 = vmatpush3.msra.mxu0 %v56_v10  ;;  %1280 = vmatprep.subr.mxu1 %v1540_v0 }
  0x3a   :  { %1257 = vmatprep.subr.mxu0 %v1540_v0  ;;  %1281 = vmatpush3.msra.mxu1 %v221_v48  ;;  %v378_v48 = vld [vmem:[#allocation4 + $0xc0] sm:$0xff] }
  0x3b   :  { %1258 = vmatpush3.msra.mxu0 %v55_v11  ;;  %1282 = vmatprep.subr.mxu1 %v1540_v0  ;;  %v1124_v11 = vld [vmem:[#allocation6 + $0x1] ss:$0 sm:$0xff] }
  0x3c   :  { %1259 = vmatprep.subr.mxu0 %v1540_v0  ;;  %1283 = vmatpush3.msra.mxu1 %v220_v49 }
  0x3d   :  { %1260 = vmatpush3.msra.mxu0 %v54_v12  ;;  %1284 = vmatprep.subr.mxu1 %v1540_v0 }
  0x3e   :  { %1262 = vmatmul.mubr.msk.f32.vlgmr.msra.gmra.mxu0 %vm71_vm1, %v53_v13  ;;  %1291 = vmatprep.subr.mxu0 %v1540_v0 }
  0x3f   :  { %1315 = vmatprep.mubr.msk.f32.mxu0 %vm1541_vm0, %v1540_v0  ;;  %1285 = vmatpush3.msra.mxu1 %v219_v50 }
  0x40   :  { %1286 = vmatprep.subr.mxu1 %v1540_v0 }
  0x41   :  { %1287 = vmatpush3.msra.mxu1 %v218_v51 }
  0x42   :  { %1318 = vmatprep.subr.mxu1 %v1540_v0 }
  0xfe   :  { %v141_v15 = vpop.f32.mrf.mxu0 }
  0xff   :  { %v142_v16 = vadd.f32 %v1120_v14, %v141_v15 }
 0x100   :  { %v1263_v17 = vpop.f32.mrf.mxu0 }
 0x101   :  { %163 = vrot.lane.b32.xlu0 %v142_v16, %s1542_s0  ;;  %v148_v18 = vsel %vm147_vm2, %v142_v16, 0.0 }
 0x105   :  { %183 = vrot.lane.b32.xlu0 %v142_v16, %s1543_s2 }
 0x124   :  { %149 = vadd.xlane.f32.xlu0 %v148_v18 }
 0x173   :  { %v164_v19 = vpop.permute.xlu0 %163 }
 0x174   :  { %v166_v20 = vsel %vm147_vm2, %v164_v19, 0.0 }
 0x175   :  { %167 = vadd.xlane.f32.xlu1 %v166_v20 }
 0x177   :  { %v184_v21 = vpop.permute.xlu0 %183 }
 0x178   :  { %v186_v22 = vsel %vm147_vm2, %v184_v21, 0.0 }
 0x179   :  { %187 = vadd.xlane.f32.xlu1 %v186_v22 }
 0x1ad   :  { %v150_v31 = vpop.xlane.xlu0 %149 }
 0x1ae   :  { %v152_v32 = vmul.f32 0.03125, %v150_v31 }
 0x1b0   :  { %v153_v33 = vsub.f32 %v142_v16, %v152_v32 }
 0x1b2   :  { %v154_v34 = vmul.f32 %v153_v33, %v153_v33 }
 0x1b4   :  { %v155_v35 = vsel %vm147_vm2, %v154_v34, 0.0 }
 0x1fe   :  { %v168_v23 = vpop.xlane.xlu1 %167 }
 0x1ff   :  { %v169_v24 = vmul.f32 0.03125, %v168_v23 }
 0x201   :  { %v1599_v25 = vsub.f32 %v142_v16, %v169_v24 }
 0x202   :  { %v188_v26 = vpop.xlane.xlu1 %187 }
 0x203   :  { %v189_v27 = vmul.f32 0.03125, %v188_v26  ;;  %v171_v28 = vmul.f32 %v1599_v25, %v1599_v25 }
 0x205   :  { %v1603_v29 = vsub.f32 %v142_v16, %v189_v27  ;;  %173 = vrot.lane.b32.xlu1 %v171_v28, %s1542_s0 }
 0x207   :  { %v191_v30 = vmul.f32 %v1603_v29, %v1603_v29 }
 0x209   :  { %193 = vrot.lane.b32.xlu1 %v191_v30, %s1543_s2 }
 0x22d   :  { %156 = vadd.xlane.f32.xlu1 %v155_v35 }
 0x277   :  { %v174_v36 = vpop.permute.xlu1 %173 }
 0x278   :  { %v176_v37 = vsel %vm147_vm2, %v174_v36, 0.0 }
 0x279   :  { %177 = vadd.xlane.f32.xlu0 %v176_v37  ;;  %v389_v37 = vld [vmem:[#allocation4 + $0x118] sm:$0xff] }
 0x27a   :  { %1292 = vmatpush3.msra.mxu0 %v389_v37  ;;  %v546_v37 = vld [vmem:[#allocation4 + $0x160] sm:$0xff] }
 0x27b   :  { %v194_v38 = vpop.permute.xlu1 %193  ;;  %1293 = vmatprep.subr.mxu0 %v1540_v0 }
 0x27c   :  { %v196_v39 = vsel %vm147_vm2, %v194_v38, 0.0  ;;  %v388_v38 = vld [vmem:[#allocation4 + $0x110] sm:$0xff] }
 0x27d   :  { %197 = vadd.xlane.f32.xlu0 %v196_v39  ;;  %1294 = vmatpush3.msra.mxu0 %v388_v38  ;;  %v387_v39 = vld [vmem:[#allocation4 + $0x108] sm:$0xff]  ;;  %v545_v38 = vld [vmem:[#allocation4 + $0x158] sm:$0xff] }
 0x27e   :  { %1295 = vmatprep.subr.mxu0 %v1540_v0 }
 0x27f   :  { %1296 = vmatpush3.msra.mxu0 %v387_v39  ;;  %v544_v39 = vld [vmem:[#allocation4 + $0x150] sm:$0xff] }
 0x280   :  { %1297 = vmatprep.subr.mxu0 %v1540_v0 }
 0x281   :  { %1298 = vmatpush3.msra.mxu0 %v386_v40  ;;  %v543_v40 = vld [vmem:[#allocation4 + $0x148] sm:$0xff] }
 0x282   :  { %1299 = vmatprep.subr.mxu0 %v1540_v0 }
 0x283   :  { %1300 = vmatpush3.msra.mxu0 %v385_v41  ;;  %v542_v41 = vld [vmem:[#allocation4 + $0x140] sm:$0xff] }
 0x284   :  { %1301 = vmatprep.subr.mxu0 %v1540_v0 }
 0x285   :  { %1302 = vmatpush3.msra.mxu0 %v384_v42  ;;  %v541_v42 = vld [vmem:[#allocation4 + $0x138] sm:$0xff] }
 0x286   :  { %1303 = vmatprep.subr.mxu0 %v1540_v0 }
 0x287   :  { %1304 = vmatpush3.msra.mxu0 %v383_v43  ;;  %v540_v43 = vld [vmem:[#allocation4 + $0x130] sm:$0xff] }
 0x288   :  { %1305 = vmatprep.subr.mxu0 %v1540_v0 }
 0x289   :  { %1306 = vmatpush3.msra.mxu0 %v382_v44  ;;  %v539_v44 = vld [vmem:[#allocation4 + $0x128] sm:$0xff] }
 0x28a   :  { %1307 = vmatprep.subr.mxu0 %v1540_v0 }
 0x28b   :  { %1308 = vmatpush3.msra.mxu0 %v381_v45  ;;  %v538_v45 = vld [vmem:[#allocation4 + $0x120] sm:$0xff] }
 0x28c   :  { %1309 = vmatprep.subr.mxu0 %v1540_v0 }
 0x28d   :  { %1310 = vmatpush3.msra.mxu0 %v380_v46 }
 0x28e   :  { %1311 = vmatprep.subr.mxu0 %v1540_v0 }
 0x28f   :  { %1312 = vmatpush3.msra.mxu0 %v379_v47 }
 0x290   :  { %1313 = vmatprep.subr.mxu0 %v1540_v0 }
 0x291   :  { %1314 = vmatpush3.msra.mxu0 %v378_v48 }
 0x292   :  { %1345 = vmatprep.subr.mxu0 %v1540_v0 }
 0x2b6   :  { %v157_v52 = vpop.xlane.xlu1 %156 }
 0x2b7   :  { %v158_v53 = vmul.f32 0.03125, %v157_v52 }
 0x2b9   :  { %v159_v56 = vadd.f32 1e-05, %v158_v53 }
 0x302   :  { %v178_v54 = vpop.xlane.xlu0 %177 }
 0x303   :  { %v179_v55 = vmul.f32 0.03125, %v178_v54 }
 0x305   :  { %v180_v57 = vadd.f32 1e-05, %v179_v55 }
 0x306   :  { %v198_v58 = vpop.xlane.xlu0 %197 }
 0x307   :  { %1435 = vrsqrt.f32 %v180_v57  ;;  %v199_v59 = vmul.f32 0.03125, %v198_v58 }
 0x308   :  { %1437 = vrsqrt.f32 %v159_v56 }
 0x309   :  { %v200_v60 = vadd.f32 1e-05, %v199_v59 }
 0x30b   :  { %1439 = vrsqrt.f32 %v200_v60 }
 0x314   :  { %v1436_v61 = vpop.eup %1435 }
 0x315   :  { %v1438_v62 = vpop.eup %1437  ;;  %v182_v63 = vmul.f32 %v1436_v61, %v1599_v25 }
 0x316   :  { %v161_v2 = vmul.f32 %v1438_v62, %v153_v33 }
 0x318   :  { %v1440_v1 = vpop.eup %1439  ;;  %v203_v5 = vsel %vm147_vm2, %v161_v2, %v182_v63 }
 0x319   :  { %v202_v4 = vmul.f32 %v1440_v1, %v1603_v29  ;;  %v1126_v1 = vld [vmem:[#allocation6 + $0x8] ss:$0 sm:$0xff] }
 0x31b   :  { %v205_v7 = vsel %vm204_vm3, %v203_v5, %v202_v4 }
 0x31c   :  { %v210_v8 = vmul.f32 %v1122_v3, %v205_v7  ;;  %v1127_v3 = vld [vmem:[#allocation6 + $0xe] ss:$0 sm:$0xff] }
 0x31e   :  { %v215_v9 = vadd.f32 %v1123_v6, %v210_v8  ;;  %v1128_v8 = vld [vmem:[#allocation6 + $0x2] ss:$0 sm:$0xff] }
 0x320   :  { %v216_v10 = vmax.f32 %v215_v9, 0.0 }
 0x322   :  { %1289 = vmatmul.mubr.msk.f32.vlgmr.msra.gmra.mxu1 %vm71_vm1, %v216_v10 }
 0x323   :  { %1342 = vmatprep.mubr.msk.f32.mxu1 %vm1541_vm0, %v1540_v0 }
 0x3e2   :  { %v304_v12 = vpop.f32.mrf.mxu1 }
 0x3e3   :  { %v305_v13 = vadd.f32 %v1124_v11, %v304_v12 }
 0x3e4   :  { %v1290_v14 = vpop.f32.mrf.mxu1 }
 0x3e5   :  { %344 = vrot.lane.b32.xlu1 %v305_v13, %s1543_s2  ;;  %324 = vrot.lane.b32.xlu0 %v305_v13, %s1542_s0  ;;  %v310_v19 = vsel %vm147_vm2, %v305_v13, 0.0 }
 0x457   :  { %v345_v15 = vpop.permute.xlu1 %344  ;;  %v325_v16 = vpop.permute.xlu0 %324 }
 0x458   :  { %v347_v17 = vsel %vm147_vm2, %v345_v15, 0.0  ;;  %v327_v18 = vsel %vm147_vm2, %v325_v16, 0.0 }
 0x459   :  { %348 = vadd.xlane.f32.xlu1 %v347_v17  ;;  %328 = vadd.xlane.f32.xlu0 %v327_v18 }
 0x45d   :  { %311 = vadd.xlane.f32.xlu0 %v310_v19 }
 0x4e2   :  { %v349_v20 = vpop.xlane.xlu1 %348  ;;  %v329_v21 = vpop.xlane.xlu0 %328 }
 0x4e3   :  { %v350_v22 = vmul.f32 0.03125, %v349_v20  ;;  %v330_v23 = vmul.f32 0.03125, %v329_v21 }
 0x4e5   :  { %v1636_v24 = vsub.f32 %v305_v13, %v350_v22  ;;  %v1638_v25 = vsub.f32 %v305_v13, %v330_v23 }
 0x4e6   :  { %v312_v28 = vpop.xlane.xlu0 %311 }
 0x4e7   :  { %v352_v26 = vmul.f32 %v1636_v24, %v1636_v24  ;;  %v332_v27 = vmul.f32 %v1638_v25, %v1638_v25  ;;  %v313_v29 = vmul.f32 0.03125, %v312_v28 }
 0x4e9   :  { %354 = vrot.lane.b32.xlu1 %v352_v26, %s1543_s2  ;;  %334 = vrot.lane.b32.xlu0 %v332_v27, %s1542_s0  ;;  %v314_v30 = vsub.f32 %v305_v13, %v313_v29 }
 0x4eb   :  { %v315_v31 = vmul.f32 %v314_v30, %v314_v30 }
 0x4ed   :  { %v316_v32 = vsel %vm147_vm2, %v315_v31, 0.0 }
 0x508   :  { %317 = vadd.xlane.f32.xlu0 %v316_v32 }
 0x55b   :  { %v355_v33 = vpop.permute.xlu1 %354  ;;  %v335_v34 = vpop.permute.xlu0 %334 }
 0x55c   :  { %v357_v35 = vsel %vm147_vm2, %v355_v33, 0.0  ;;  %v337_v36 = vsel %vm147_vm2, %v335_v34, 0.0  ;;  %v549_v34 = vld [vmem:[#allocation4 + $0x178] sm:$0xff] }
 0x55d   :  { %358 = vadd.xlane.f32.xlu0 %v357_v35  ;;  %338 = vadd.xlane.f32.xlu1 %v337_v36  ;;  %v548_v35 = vld [vmem:[#allocation4 + $0x170] sm:$0xff]  ;;  %v547_v36 = vld [vmem:[#allocation4 + $0x168] sm:$0xff] }
 0x55e   :  { %1319 = vmatpush3.msra.mxu1 %v549_v34  ;;  %v706_v34 = vld [vmem:[#allocation4 + $0x1c0] sm:$0xff] }
 0x55f   :  { %1320 = vmatprep.subr.mxu1 %v1540_v0 }
 0x560   :  { %1321 = vmatpush3.msra.mxu1 %v548_v35  ;;  %v705_v35 = vld [vmem:[#allocation4 + $0x1b8] sm:$0xff] }
 0x561   :  { %1322 = vmatprep.subr.mxu1 %v1540_v0 }
 0x562   :  { %1323 = vmatpush3.msra.mxu1 %v547_v36  ;;  %v704_v36 = vld [vmem:[#allocation4 + $0x1b0] sm:$0xff] }
 0x563   :  { %1324 = vmatprep.subr.mxu1 %v1540_v0 }
 0x564   :  { %1325 = vmatpush3.msra.mxu1 %v546_v37  ;;  %v703_v37 = vld [vmem:[#allocation4 + $0x1a8] sm:$0xff] }
 0x565   :  { %1326 = vmatprep.subr.mxu1 %v1540_v0 }
 0x566   :  { %1327 = vmatpush3.msra.mxu1 %v545_v38  ;;  %v702_v38 = vld [vmem:[#allocation4 + $0x1a0] sm:$0xff] }
 0x567   :  { %1328 = vmatprep.subr.mxu1 %v1540_v0 }
 0x568   :  { %1329 = vmatpush3.msra.mxu1 %v544_v39  ;;  %v701_v39 = vld [vmem:[#allocation4 + $0x198] sm:$0xff] }
 0x569   :  { %1330 = vmatprep.subr.mxu1 %v1540_v0 }
 0x56a   :  { %1331 = vmatpush3.msra.mxu1 %v543_v40  ;;  %v700_v40 = vld [vmem:[#allocation4 + $0x190] sm:$0xff] }
 0x56b   :  { %1332 = vmatprep.subr.mxu1 %v1540_v0 }
 0x56c   :  { %1333 = vmatpush3.msra.mxu1 %v542_v41  ;;  %v699_v41 = vld [vmem:[#allocation4 + $0x188] sm:$0xff] }
 0x56d   :  { %1334 = vmatprep.subr.mxu1 %v1540_v0 }
 0x56e   :  { %1335 = vmatpush3.msra.mxu1 %v541_v42  ;;  %v698_v42 = vld [vmem:[#allocation4 + $0x180] sm:$0xff] }
 0x56f   :  { %1336 = vmatprep.subr.mxu1 %v1540_v0 }
 0x570   :  { %1337 = vmatpush3.msra.mxu1 %v540_v43 }
 0x571   :  { %1338 = vmatprep.subr.mxu1 %v1540_v0 }
 0x572   :  { %1339 = vmatpush3.msra.mxu1 %v539_v44 }
 0x573   :  { %1340 = vmatprep.subr.mxu1 %v1540_v0 }
 0x574   :  { %1341 = vmatpush3.msra.mxu1 %v538_v45 }
 0x575   :  { %1372 = vmatprep.subr.mxu1 %v1540_v0 }
 0x591   :  { %v318_v49 = vpop.xlane.xlu0 %317 }
 0x592   :  { %v319_v50 = vmul.f32 0.03125, %v318_v49 }
 0x594   :  { %v320_v51 = vadd.f32 1e-05, %v319_v50 }
 0x596   :  { %1441 = vrsqrt.f32 %v320_v51 }
 0x5a3   :  { %v1442_v58 = vpop.eup %1441 }
 0x5a4   :  { %v322_v61 = vmul.f32 %v1442_v58, %v314_v30 }
 0x5e6   :  { %v339_v52 = vpop.xlane.xlu1 %338  ;;  %v359_v53 = vpop.xlane.xlu0 %358 }
 0x5e7   :  { %v340_v54 = vmul.f32 0.03125, %v339_v52  ;;  %v360_v55 = vmul.f32 0.03125, %v359_v53 }
 0x5e9   :  { %v341_v56 = vadd.f32 1e-05, %v340_v54  ;;  %v361_v57 = vadd.f32 1e-05, %v360_v55 }
 0x5eb   :  { %1443 = vrsqrt.f32 %v341_v56 }
 0x5ec   :  { %1445 = vrsqrt.f32 %v361_v57 }
 0x5f8   :  { %v1444_v59 = vpop.eup %1443 }
 0x5f9   :  { %v1446_v60 = vpop.eup %1445  ;;  %v343_v62 = vmul.f32 %v1444_v59, %v1638_v25 }
 0x5fa   :  { %v363_v63 = vmul.f32 %v1446_v60, %v1636_v24 }
 0x5fb   :  { %v364_v2 = vsel %vm147_vm2, %v322_v61, %v343_v62  ;;  %v1130_v61 = vld [vmem:[#allocation6 + $0x9] ss:$0 sm:$0xff] }
 0x5fc   :  { %v365_v4 = vsel %vm204_vm3, %v364_v2, %v363_v63  ;;  %v1131_v63 = vld [vmem:[#allocation6 + $0xf] ss:$0 sm:$0xff] }
 0x5fd   :  { %v370_v5 = vmul.f32 %v1126_v1, %v365_v4 }
 0x5ff   :  { %v375_v6 = vadd.f32 %v1127_v3, %v370_v5  ;;  %v1132_v5 = vld [vmem:[#allocation6 + $0x3] ss:$0 sm:$0xff] }
 0x601   :  { %v376_v7 = vmax.f32 %v375_v6, 0.0 }
 0x603   :  { %1316 = vmatmul.mubr.msk.f32.vlgmr.msra.gmra.mxu0 %vm71_vm1, %v376_v7 }
 0x604   :  { %1369 = vmatprep.mubr.msk.f32.mxu0 %vm1541_vm0, %v1540_v0 }
 0x6c3   :  { %v464_v9 = vpop.f32.mrf.mxu0 }
 0x6c4   :  { %v465_v10 = vadd.f32 %v1128_v8, %v464_v9 }
 0x6c5   :  { %v1317_v11 = vpop.f32.mrf.mxu0 }
 0x6c6   :  { %504 = vrot.lane.b32.xlu1 %v465_v10, %s1543_s2  ;;  %484 = vrot.lane.b32.xlu0 %v465_v10, %s1542_s0  ;;  %v470_v16 = vsel %vm147_vm2, %v465_v10, 0.0 }
 0x738   :  { %v505_v12 = vpop.permute.xlu1 %504  ;;  %v485_v13 = vpop.permute.xlu0 %484 }
 0x739   :  { %v507_v14 = vsel %vm147_vm2, %v505_v12, 0.0  ;;  %v487_v15 = vsel %vm147_vm2, %v485_v13, 0.0 }
 0x73a   :  { %508 = vadd.xlane.f32.xlu1 %v507_v14  ;;  %488 = vadd.xlane.f32.xlu0 %v487_v15 }
 0x73e   :  { %471 = vadd.xlane.f32.xlu0 %v470_v16 }
 0x7c3   :  { %v509_v17 = vpop.xlane.xlu1 %508  ;;  %v489_v18 = vpop.xlane.xlu0 %488 }
 0x7c4   :  { %v510_v19 = vmul.f32 0.03125, %v509_v17  ;;  %v490_v20 = vmul.f32 0.03125, %v489_v18 }
 0x7c6   :  { %v1673_v21 = vsub.f32 %v465_v10, %v510_v19  ;;  %v1675_v22 = vsub.f32 %v465_v10, %v490_v20 }
 0x7c7   :  { %v472_v25 = vpop.xlane.xlu0 %471 }
 0x7c8   :  { %v512_v23 = vmul.f32 %v1673_v21, %v1673_v21  ;;  %v492_v24 = vmul.f32 %v1675_v22, %v1675_v22  ;;  %v473_v26 = vmul.f32 0.03125, %v472_v25 }
 0x7ca   :  { %514 = vrot.lane.b32.xlu1 %v512_v23, %s1543_s2  ;;  %494 = vrot.lane.b32.xlu0 %v492_v24, %s1542_s0  ;;  %v474_v27 = vsub.f32 %v465_v10, %v473_v26 }
 0x7cc   :  { %v475_v28 = vmul.f32 %v474_v27, %v474_v27 }
 0x7ce   :  { %v476_v29 = vsel %vm147_vm2, %v475_v28, 0.0 }
 0x7e9   :  { %477 = vadd.xlane.f32.xlu0 %v476_v29 }
 0x83c   :  { %v515_v30 = vpop.permute.xlu1 %514  ;;  %v495_v31 = vpop.permute.xlu0 %494 }
 0x83d   :  { %v517_v32 = vsel %vm147_vm2, %v515_v30, 0.0  ;;  %v497_v33 = vsel %vm147_vm2, %v495_v31, 0.0  ;;  %v709_v31 = vld [vmem:[#allocation4 + $0x1d8] sm:$0xff] }
 0x83e   :  { %518 = vadd.xlane.f32.xlu0 %v517_v32  ;;  %498 = vadd.xlane.f32.xlu1 %v497_v33  ;;  %v708_v32 = vld [vmem:[#allocation4 + $0x1d0] sm:$0xff]  ;;  %v707_v33 = vld [vmem:[#allocation4 + $0x1c8] sm:$0xff] }
 0x83f   :  { %1346 = vmatpush3.msra.mxu0 %v709_v31  ;;  %v868_v31 = vld [vmem:[#allocation4 + $0x220] sm:$0xff] }
 0x840   :  { %1347 = vmatprep.subr.mxu0 %v1540_v0 }
 0x841   :  { %1348 = vmatpush3.msra.mxu0 %v708_v32  ;;  %v867_v32 = vld [vmem:[#allocation4 + $0x218] sm:$0xff] }
 0x842   :  { %1349 = vmatprep.subr.mxu0 %v1540_v0 }
 0x843   :  { %1350 = vmatpush3.msra.mxu0 %v707_v33  ;;  %v866_v33 = vld [vmem:[#allocation4 + $0x210] sm:$0xff] }
 0x844   :  { %1351 = vmatprep.subr.mxu0 %v1540_v0 }
 0x845   :  { %1352 = vmatpush3.msra.mxu0 %v706_v34  ;;  %v865_v34 = vld [vmem:[#allocation4 + $0x208] sm:$0xff] }
 0x846   :  { %1353 = vmatprep.subr.mxu0 %v1540_v0 }
 0x847   :  { %1354 = vmatpush3.msra.mxu0 %v705_v35  ;;  %v864_v35 = vld [vmem:[#allocation4 + $0x200] sm:$0xff] }
 0x848   :  { %1355 = vmatprep.subr.mxu0 %v1540_v0 }
 0x849   :  { %1356 = vmatpush3.msra.mxu0 %v704_v36  ;;  %v863_v36 = vld [vmem:[#allocation4 + $0x1f8] sm:$0xff] }
 0x84a   :  { %1357 = vmatprep.subr.mxu0 %v1540_v0 }
 0x84b   :  { %1358 = vmatpush3.msra.mxu0 %v703_v37  ;;  %v862_v37 = vld [vmem:[#allocation4 + $0x1f0] sm:$0xff] }
 0x84c   :  { %1359 = vmatprep.subr.mxu0 %v1540_v0 }
 0x84d   :  { %1360 = vmatpush3.msra.mxu0 %v702_v38  ;;  %v861_v38 = vld [vmem:[#allocation4 + $0x1e8] sm:$0xff] }
 0x84e   :  { %1361 = vmatprep.subr.mxu0 %v1540_v0 }
 0x84f   :  { %1362 = vmatpush3.msra.mxu0 %v701_v39  ;;  %v860_v39 = vld [vmem:[#allocation4 + $0x1e0] sm:$0xff] }
 0x850   :  { %1363 = vmatprep.subr.mxu0 %v1540_v0 }
 0x851   :  { %1364 = vmatpush3.msra.mxu0 %v700_v40 }
 0x852   :  { %1365 = vmatprep.subr.mxu0 %v1540_v0 }
 0x853   :  { %1366 = vmatpush3.msra.mxu0 %v699_v41 }
 0x854   :  { %1367 = vmatprep.subr.mxu0 %v1540_v0 }
 0x855   :  { %1368 = vmatpush3.msra.mxu0 %v698_v42 }
 0x856   :  { %1399 = vmatprep.subr.mxu0 %v1540_v0 }
 0x872   :  { %v478_v46 = vpop.xlane.xlu0 %477 }
 0x873   :  { %v479_v47 = vmul.f32 0.03125, %v478_v46 }
 0x875   :  { %v480_v48 = vadd.f32 1e-05, %v479_v47 }
 0x877   :  { %1447 = vrsqrt.f32 %v480_v48 }
 0x884   :  { %v1448_v55 = vpop.eup %1447 }
 0x885   :  { %v482_v58 = vmul.f32 %v1448_v55, %v474_v27 }
 0x8c7   :  { %v499_v49 = vpop.xlane.xlu1 %498  ;;  %v519_v50 = vpop.xlane.xlu0 %518 }
 0x8c8   :  { %v500_v51 = vmul.f32 0.03125, %v499_v49  ;;  %v520_v52 = vmul.f32 0.03125, %v519_v50 }
 0x8ca   :  { %v501_v53 = vadd.f32 1e-05, %v500_v51  ;;  %v521_v54 = vadd.f32 1e-05, %v520_v52 }
 0x8cc   :  { %1449 = vrsqrt.f32 %v501_v53 }
 0x8cd   :  { %1451 = vrsqrt.f32 %v521_v54 }
 0x8d9   :  { %v1450_v56 = vpop.eup %1449 }
 0x8da   :  { %v1452_v57 = vpop.eup %1451  ;;  %v503_v59 = vmul.f32 %v1450_v56, %v1675_v22 }
 0x8db   :  { %v523_v60 = vmul.f32 %v1452_v57, %v1673_v21 }
 0x8dc   :  { %v524_v62 = vsel %vm147_vm2, %v482_v58, %v503_v59  ;;  %v1134_v58 = vld [vmem:[#allocation6 + $0xa] ss:$0 sm:$0xff] }
 0x8dd   :  { %v525_v1 = vsel %vm204_vm3, %v524_v62, %v523_v60  ;;  %v1135_v60 = vld [vmem:[#allocation6 + $0x10] ss:$0 sm:$0xff] }
 0x8de   :  { %v530_v2 = vmul.f32 %v1130_v61, %v525_v1 }
 0x8e0   :  { %v535_v3 = vadd.f32 %v1131_v63, %v530_v2  ;;  %v1136_v2 = vld [vmem:[#allocation6 + $0x4] ss:$0 sm:$0xff] }
 0x8e2   :  { %v536_v4 = vmax.f32 %v535_v3, 0.0 }
 0x8e4   :  { %1343 = vmatmul.mubr.msk.f32.vlgmr.msra.gmra.mxu1 %vm71_vm1, %v536_v4 }
 0x8e5   :  { %1396 = vmatprep.mubr.msk.f32.mxu1 %vm1541_vm0, %v1540_v0 }
 0x9a4   :  { %v624_v6 = vpop.f32.mrf.mxu1 }
 0x9a5   :  { %v625_v7 = vadd.f32 %v1132_v5, %v624_v6 }
 0x9a6   :  { %v1344_v8 = vpop.f32.mrf.mxu1 }
 0x9a7   :  { %664 = vrot.lane.b32.xlu1 %v625_v7, %s1543_s2  ;;  %644 = vrot.lane.b32.xlu0 %v625_v7, %s1542_s0  ;;  %v630_v13 = vsel %vm147_vm2, %v625_v7, 0.0 }
 0xa19   :  { %v665_v9 = vpop.permute.xlu1 %664  ;;  %v645_v10 = vpop.permute.xlu0 %644 }
 0xa1a   :  { %v667_v11 = vsel %vm147_vm2, %v665_v9, 0.0  ;;  %v647_v12 = vsel %vm147_vm2, %v645_v10, 0.0 }
 0xa1b   :  { %668 = vadd.xlane.f32.xlu0 %v667_v11  ;;  %648 = vadd.xlane.f32.xlu1 %v647_v12 }
 0xa1f   :  { %631 = vadd.xlane.f32.xlu0 %v630_v13 }
 0xaa4   :  { %v649_v14 = vpop.xlane.xlu1 %648  ;;  %v669_v15 = vpop.xlane.xlu0 %668 }
 0xaa5   :  { %v650_v16 = vmul.f32 0.03125, %v649_v14  ;;  %v670_v17 = vmul.f32 0.03125, %v669_v15 }
 0xaa7   :  { %v1710_v18 = vsub.f32 %v625_v7, %v650_v16  ;;  %v1712_v19 = vsub.f32 %v625_v7, %v670_v17 }
 0xaa8   :  { %v632_v22 = vpop.xlane.xlu0 %631 }
 0xaa9   :  { %v652_v20 = vmul.f32 %v1710_v18, %v1710_v18  ;;  %v672_v21 = vmul.f32 %v1712_v19, %v1712_v19  ;;  %v633_v23 = vmul.f32 0.03125, %v632_v22 }
 0xaab   :  { %654 = vrot.lane.b32.xlu1 %v652_v20, %s1542_s0  ;;  %674 = vrot.lane.b32.xlu0 %v672_v21, %s1543_s2  ;;  %v634_v24 = vsub.f32 %v625_v7, %v633_v23 }
 0xaad   :  { %v635_v25 = vmul.f32 %v634_v24, %v634_v24 }
 0xaaf   :  { %v636_v26 = vsel %vm147_vm2, %v635_v25, 0.0 }
 0xacf   :  { %637 = vadd.xlane.f32.xlu1 %v636_v26 }
 0xb1d   :  { %v655_v27 = vpop.permute.xlu1 %654  ;;  %v675_v28 = vpop.permute.xlu0 %674 }
 0xb1e   :  { %v657_v29 = vsel %vm147_vm2, %v655_v27, 0.0  ;;  %v677_v30 = vsel %vm147_vm2, %v675_v28, 0.0  ;;  %v871_v28 = vld [vmem:[#allocation4 + $0x238] sm:$0xff] }
 0xb1f   :  { %658 = vadd.xlane.f32.xlu0 %v657_v29  ;;  %678 = vadd.xlane.f32.xlu1 %v677_v30  ;;  %v870_v29 = vld [vmem:[#allocation4 + $0x230] sm:$0xff]  ;;  %v869_v30 = vld [vmem:[#allocation4 + $0x228] sm:$0xff] }
 0xb20   :  { %1373 = vmatpush3.msra.mxu1 %v871_v28  ;;  %v1030_v28 = vld [vmem:[#allocation4 + $0x280] sm:$0xff] }
 0xb21   :  { %1374 = vmatprep.subr.mxu1 %v1540_v0 }
 0xb22   :  { %1375 = vmatpush3.msra.mxu1 %v870_v29  ;;  %v1029_v29 = vld [vmem:[#allocation4 + $0x278] sm:$0xff] }
 0xb23   :  { %1376 = vmatprep.subr.mxu1 %v1540_v0 }
 0xb24   :  { %1377 = vmatpush3.msra.mxu1 %v869_v30  ;;  %v1028_v30 = vld [vmem:[#allocation4 + $0x270] sm:$0xff] }
 0xb25   :  { %1378 = vmatprep.subr.mxu1 %v1540_v0 }
 0xb26   :  { %1379 = vmatpush3.msra.mxu1 %v868_v31  ;;  %v1027_v31 = vld [vmem:[#allocation4 + $0x268] sm:$0xff] }
 0xb27   :  { %1380 = vmatprep.subr.mxu1 %v1540_v0 }
 0xb28   :  { %1381 = vmatpush3.msra.mxu1 %v867_v32  ;;  %v1026_v32 = vld [vmem:[#allocation4 + $0x260] sm:$0xff] }
 0xb29   :  { %1382 = vmatprep.subr.mxu1 %v1540_v0 }
 0xb2a   :  { %1383 = vmatpush3.msra.mxu1 %v866_v33  ;;  %v1025_v33 = vld [vmem:[#allocation4 + $0x258] sm:$0xff] }
 0xb2b   :  { %1384 = vmatprep.subr.mxu1 %v1540_v0 }
 0xb2c   :  { %1385 = vmatpush3.msra.mxu1 %v865_v34  ;;  %v1024_v34 = vld [vmem:[#allocation4 + $0x250] sm:$0xff] }
 0xb2d   :  { %1386 = vmatprep.subr.mxu1 %v1540_v0 }
 0xb2e   :  { %1387 = vmatpush3.msra.mxu1 %v864_v35  ;;  %v1023_v35 = vld [vmem:[#allocation4 + $0x248] sm:$0xff] }
 0xb2f   :  { %1388 = vmatprep.subr.mxu1 %v1540_v0 }
 0xb30   :  { %1389 = vmatpush3.msra.mxu1 %v863_v36  ;;  %v1022_v36 = vld [vmem:[#allocation4 + $0x240] sm:$0xff] }
 0xb31   :  { %1390 = vmatprep.subr.mxu1 %v1540_v0 }
 0xb32   :  { %1391 = vmatpush3.msra.mxu1 %v862_v37 }
 0xb33   :  { %1392 = vmatprep.subr.mxu1 %v1540_v0 }
 0xb34   :  { %1393 = vmatpush3.msra.mxu1 %v861_v38 }
 0xb35   :  { %1394 = vmatprep.subr.mxu1 %v1540_v0 }
 0xb36   :  { %1395 = vmatpush3.msra.mxu1 %v860_v39 }
 0xb58   :  { %v638_v43 = vpop.xlane.xlu1 %637 }
 0xb59   :  { %v639_v44 = vmul.f32 0.03125, %v638_v43 }
 0xb5b   :  { %v640_v45 = vadd.f32 1e-05, %v639_v44 }
 0xb5d   :  { %1453 = vrsqrt.f32 %v640_v45 }
 0xb6a   :  { %v1454_v52 = vpop.eup %1453 }
 0xb6b   :  { %v642_v56 = vmul.f32 %v1454_v52, %v634_v24 }
 0xba8   :  { %v679_v46 = vpop.xlane.xlu1 %678  ;;  %v659_v47 = vpop.xlane.xlu0 %658 }
 0xba9   :  { %v680_v48 = vmul.f32 0.03125, %v679_v46  ;;  %v660_v49 = vmul.f32 0.03125, %v659_v47 }
 0xbab   :  { %v681_v50 = vadd.f32 1e-05, %v680_v48  ;;  %v661_v51 = vadd.f32 1e-05, %v660_v49 }
 0xbad   :  { %1455 = vrsqrt.f32 %v681_v50 }
 0xbae   :  { %1457 = vrsqrt.f32 %v661_v51 }
 0xbba   :  { %v1456_v53 = vpop.eup %1455 }
 0xbbb   :  { %v1458_v54 = vpop.eup %1457  ;;  %v683_v55 = vmul.f32 %v1456_v53, %v1712_v19 }
 0xbbc   :  { %v663_v57 = vmul.f32 %v1458_v54, %v1710_v18 }
 0xbbe   :  { %v684_v59 = vsel %vm147_vm2, %v642_v56, %v663_v57  ;;  %v1139_v57 = vld [vmem:[#allocation6 + $0x11] ss:$0 sm:$0xff] }
 0xbbf   :  { %v685_v61 = vsel %vm204_vm3, %v684_v59, %v683_v55  ;;  %v1138_v55 = vld [vmem:[#allocation6 + $0xb] ss:$0 sm:$0xff] }
 0xbc0   :  { %v690_v62 = vmul.f32 %v1134_v58, %v685_v61 }
 0xbc2   :  { %v695_v63 = vadd.f32 %v1135_v60, %v690_v62  ;;  %v1140_v62 = vld [vmem:[#allocation6 + $0x5] ss:$0 sm:$0xff] }
 0xbc4   :  { %v696_v1 = vmax.f32 %v695_v63, 0.0 }
 0xbc6   :  { %1370 = vmatmul.mubr.msk.f32.vlgmr.msra.gmra.mxu0 %vm71_vm1, %v696_v1 }
 0xbc7   :  { %1423 = vmatprep.mubr.msk.f32.mxu0 %vm1541_vm0, %v1540_v0 }
 0xc86   :  { %v784_v3 = vpop.f32.mrf.mxu0 }
 0xc87   :  { %v785_v4 = vadd.f32 %v1136_v2, %v784_v3 }
 0xc88   :  { %v1371_v5 = vpop.f32.mrf.mxu0 }
 0xc89   :  { %826 = vrot.lane.b32.xlu1 %v785_v4, %s1543_s2  ;;  %806 = vrot.lane.b32.xlu0 %v785_v4, %s1542_s0  ;;  %v791_v10 = vsel %vm790_vm4, %v785_v4, 0.0 }
 0xcfb   :  { %v827_v6 = vpop.permute.xlu1 %826  ;;  %v807_v7 = vpop.permute.xlu0 %806 }
 0xcfc   :  { %v829_v8 = vsel %vm790_vm4, %v827_v6, 0.0  ;;  %v809_v9 = vsel %vm790_vm4, %v807_v7, 0.0 }
 0xcfd   :  { %830 = vadd.xlane.f32.xlu0 %v829_v8  ;;  %810 = vadd.xlane.f32.xlu1 %v809_v9 }
 0xd01   :  { %792 = vadd.xlane.f32.xlu0 %v791_v10 }
 0xd86   :  { %v811_v11 = vpop.xlane.xlu1 %810  ;;  %v831_v12 = vpop.xlane.xlu0 %830 }
 0xd87   :  { %v812_v13 = vmul.f32 0.0625, %v811_v11  ;;  %v832_v14 = vmul.f32 0.0625, %v831_v12 }
 0xd89   :  { %v1747_v15 = vsub.f32 %v785_v4, %v812_v13  ;;  %v1749_v16 = vsub.f32 %v785_v4, %v832_v14 }
 0xd8a   :  { %v793_v19 = vpop.xlane.xlu0 %792 }
 0xd8b   :  { %v814_v17 = vmul.f32 %v1747_v15, %v1747_v15  ;;  %v834_v18 = vmul.f32 %v1749_v16, %v1749_v16  ;;  %v795_v20 = vmul.f32 0.0625, %v793_v19 }
 0xd8d   :  { %816 = vrot.lane.b32.xlu1 %v814_v17, %s1542_s0  ;;  %836 = vrot.lane.b32.xlu0 %v834_v18, %s1543_s2  ;;  %v796_v21 = vsub.f32 %v785_v4, %v795_v20 }
 0xd8f   :  { %v797_v22 = vmul.f32 %v796_v21, %v796_v21 }
 0xd91   :  { %v798_v23 = vsel %vm790_vm4, %v797_v22, 0.0 }
 0xdb1   :  { %799 = vadd.xlane.f32.xlu1 %v798_v23 }
 0xdff   :  { %v817_v24 = vpop.permute.xlu1 %816  ;;  %v837_v25 = vpop.permute.xlu0 %836 }
 0xe00   :  { %v819_v26 = vsel %vm790_vm4, %v817_v24, 0.0  ;;  %v839_v27 = vsel %vm790_vm4, %v837_v25, 0.0  ;;  %v1033_v25 = vld [vmem:[#allocation4 + $0x298] sm:$0xff] }
 0xe01   :  { %820 = vadd.xlane.f32.xlu0 %v819_v26  ;;  %840 = vadd.xlane.f32.xlu1 %v839_v27  ;;  %v1032_v26 = vld [vmem:[#allocation4 + $0x290] sm:$0xff]  ;;  %v1031_v27 = vld [vmem:[#allocation4 + $0x288] sm:$0xff] }
 0xe02   :  { %1400 = vmatpush3.msra.mxu0 %v1033_v25 }
 0xe03   :  { %1401 = vmatprep.subr.mxu0 %v1540_v0 }
 0xe04   :  { %1402 = vmatpush3.msra.mxu0 %v1032_v26 }
 0xe05   :  { %1403 = vmatprep.subr.mxu0 %v1540_v0 }
 0xe06   :  { %1404 = vmatpush3.msra.mxu0 %v1031_v27 }
 0xe07   :  { %1405 = vmatprep.subr.mxu0 %v1540_v0 }
 0xe08   :  { %1406 = vmatpush3.msra.mxu0 %v1030_v28 }
 0xe09   :  { %1407 = vmatprep.subr.mxu0 %v1540_v0 }
 0xe0a   :  { %1408 = vmatpush3.msra.mxu0 %v1029_v29 }
 0xe0b   :  { %1409 = vmatprep.subr.mxu0 %v1540_v0 }
 0xe0c   :  { %1410 = vmatpush3.msra.mxu0 %v1028_v30 }
 0xe0d   :  { %1411 = vmatprep.subr.mxu0 %v1540_v0 }
 0xe0e   :  { %1412 = vmatpush3.msra.mxu0 %v1027_v31 }
 0xe0f   :  { %1413 = vmatprep.subr.mxu0 %v1540_v0 }
 0xe10   :  { %1414 = vmatpush3.msra.mxu0 %v1026_v32 }
 0xe11   :  { %1415 = vmatprep.subr.mxu0 %v1540_v0 }
 0xe12   :  { %1416 = vmatpush3.msra.mxu0 %v1025_v33 }
 0xe13   :  { %1417 = vmatprep.subr.mxu0 %v1540_v0 }
 0xe14   :  { %1418 = vmatpush3.msra.mxu0 %v1024_v34 }
 0xe15   :  { %1419 = vmatprep.subr.mxu0 %v1540_v0 }
 0xe16   :  { %1420 = vmatpush3.msra.mxu0 %v1023_v35 }
 0xe17   :  { %1421 = vmatprep.subr.mxu0 %v1540_v0 }
 0xe18   :  { %1422 = vmatpush3.msra.mxu0 %v1022_v36 }
 0xe3a   :  { %v800_v40 = vpop.xlane.xlu1 %799 }
 0xe3b   :  { %v801_v41 = vmul.f32 0.0625, %v800_v40 }
 0xe3d   :  { %v802_v42 = vadd.f32 1e-05, %v801_v41 }
 0xe3f   :  { %1459 = vrsqrt.f32 %v802_v42 }
 0xe4c   :  { %v1460_v49 = vpop.eup %1459 }
 0xe4d   :  { %v804_v53 = vmul.f32 %v1460_v49, %v796_v21 }
 0xe8a   :  { %v841_v43 = vpop.xlane.xlu1 %840  ;;  %v821_v44 = vpop.xlane.xlu0 %820 }
 0xe8b   :  { %v842_v45 = vmul.f32 0.0625, %v841_v43  ;;  %v822_v46 = vmul.f32 0.0625, %v821_v44 }
 0xe8d   :  { %v843_v47 = vadd.f32 1e-05, %v842_v45  ;;  %v823_v48 = vadd.f32 1e-05, %v822_v46 }
 0xe8f   :  { %1461 = vrsqrt.f32 %v843_v47 }
 0xe90   :  { %1463 = vrsqrt.f32 %v823_v48 }
 0xe9c   :  { %v1462_v50 = vpop.eup %1461 }
 0xe9d   :  { %v1464_v51 = vpop.eup %1463  ;;  %v845_v52 = vmul.f32 %v1462_v50, %v1749_v16 }
 0xe9e   :  { %v825_v54 = vmul.f32 %v1464_v51, %v1747_v15  ;;  %v1142_v51 = vld [vmem:[#allocation6 + $0xc] ss:$0 sm:$0xff] }
 0xea0   :  { %v846_v56 = vsel %vm147_vm2, %v804_v53, %v825_v54  ;;  %v1143_v53 = vld [vmem:[#allocation6 + $0x12] ss:$0 sm:$0xff] }
 0xea1   :  { %v847_v58 = vsel %vm204_vm3, %v846_v56, %v845_v52 }
 0xea2   :  { %v852_v59 = vmul.f32 %v1138_v55, %v847_v58  ;;  %v1144_v58 = vld [vmem:[#allocation6 + $0x6] ss:$0 sm:$0xff] }
 0xea4   :  { %v857_v60 = vadd.f32 %v1139_v57, %v852_v59 }
 0xea6   :  { %v858_v61 = vmax.f32 %v857_v60, 0.0 }
 0xea8   :  { %1397 = vmatmul.mubr.msk.f32.vlgmr.msra.gmra.mxu1 %vm71_vm1, %v858_v61 }
 0xf68   :  { %v946_v63 = vpop.f32.mrf.mxu1 }
 0xf69   :  { %v947_v1 = vadd.f32 %v1140_v62, %v946_v63 }
 0xf6a   :  { %v1398_v2 = vpop.f32.mrf.mxu1 }
 0xf6b   :  { %988 = vrot.lane.b32.xlu1 %v947_v1, %s1543_s2  ;;  %968 = vrot.lane.b32.xlu0 %v947_v1, %s1542_s0  ;;  %v953_v7 = vsel %vm952_vm5, %v947_v1, 0.0 }
 0xfdd   :  { %v989_v3 = vpop.permute.xlu1 %988  ;;  %v969_v4 = vpop.permute.xlu0 %968 }
 0xfde   :  { %v991_v5 = vsel %vm952_vm5, %v989_v3, 0.0  ;;  %v971_v6 = vsel %vm952_vm5, %v969_v4, 0.0 }
 0xfdf   :  { %992 = vadd.xlane.f32.xlu0 %v991_v5  ;;  %972 = vadd.xlane.f32.xlu1 %v971_v6 }
 0xfe3   :  { %954 = vadd.xlane.f32.xlu0 %v953_v7 }
0x1068   :  { %v973_v8 = vpop.xlane.xlu1 %972  ;;  %v993_v9 = vpop.xlane.xlu0 %992 }
0x1069   :  { %v974_v10 = vmul.f32 0.125, %v973_v8  ;;  %v994_v11 = vmul.f32 0.125, %v993_v9 }
0x106b   :  { %v1781_v12 = vsub.f32 %v947_v1, %v974_v10  ;;  %v1783_v13 = vsub.f32 %v947_v1, %v994_v11 }
0x106c   :  { %v955_v16 = vpop.xlane.xlu0 %954 }
0x106d   :  { %v976_v14 = vmul.f32 %v1781_v12, %v1781_v12  ;;  %v996_v15 = vmul.f32 %v1783_v13, %v1783_v13  ;;  %v957_v17 = vmul.f32 0.125, %v955_v16 }
0x106f   :  { %978 = vrot.lane.b32.xlu1 %v976_v14, %s1542_s0  ;;  %998 = vrot.lane.b32.xlu0 %v996_v15, %s1543_s2  ;;  %v958_v18 = vsub.f32 %v947_v1, %v957_v17 }
0x1071   :  { %v959_v19 = vmul.f32 %v958_v18, %v958_v18 }
0x1073   :  { %v960_v20 = vsel %vm952_vm5, %v959_v19, 0.0 }
0x1093   :  { %961 = vadd.xlane.f32.xlu1 %v960_v20 }
0x10e1   :  { %v979_v21 = vpop.permute.xlu1 %978  ;;  %v999_v22 = vpop.permute.xlu0 %998 }
0x10e2   :  { %v981_v23 = vsel %vm952_vm5, %v979_v21, 0.0  ;;  %v1001_v24 = vsel %vm952_vm5, %v999_v22, 0.0 }
0x10e3   :  { %982 = vadd.xlane.f32.xlu0 %v981_v23  ;;  %1002 = vadd.xlane.f32.xlu1 %v1001_v24 }
0x111c   :  { %v962_v37 = vpop.xlane.xlu1 %961 }
0x111d   :  { %v963_v38 = vmul.f32 0.125, %v962_v37 }
0x111f   :  { %v964_v39 = vadd.f32 1e-05, %v963_v38 }
0x1121   :  { %1465 = vrsqrt.f32 %v964_v39 }
0x112e   :  { %v1466_v46 = vpop.eup %1465 }
0x112f   :  { %v966_v50 = vmul.f32 %v1466_v46, %v958_v18 }
0x116c   :  { %v1003_v40 = vpop.xlane.xlu1 %1002  ;;  %v983_v41 = vpop.xlane.xlu0 %982 }
0x116d   :  { %v1004_v42 = vmul.f32 0.125, %v1003_v40  ;;  %v984_v43 = vmul.f32 0.125, %v983_v41 }
0x116f   :  { %v1005_v44 = vadd.f32 1e-05, %v1004_v42  ;;  %v985_v45 = vadd.f32 1e-05, %v984_v43 }
0x1171   :  { %1467 = vrsqrt.f32 %v1005_v44 }
0x1172   :  { %1469 = vrsqrt.f32 %v985_v45 }
0x117e   :  { %v1468_v47 = vpop.eup %1467 }
0x117f   :  { %v1470_v48 = vpop.eup %1469  ;;  %v1007_v49 = vmul.f32 %v1468_v47, %v1783_v13 }
0x1180   :  { %v987_v0 = vmul.f32 %v1470_v48, %v1781_v12 }
0x1182   :  { %v1008_v52 = vsel %vm147_vm2, %v966_v50, %v987_v0 }
0x1183   :  { %v1009_v54 = vsel %vm204_vm3, %v1008_v52, %v1007_v49 }
0x1184   :  { %v1014_v55 = vmul.f32 %v1142_v51, %v1009_v54 }
0x1186   :  { %v1019_v56 = vadd.f32 %v1143_v53, %v1014_v55 }
0x1188   :  { %v1020_v57 = vmax.f32 %v1019_v56, 0.0 }
0x118a   :  { %1424 = vmatmul.mubr.msk.f32.vlgmr.msra.gmra.mxu0 %vm71_vm1, %v1020_v57 }
0x124a   :  { %v1108_v59 = vpop.f32.mrf.mxu0 }
0x124b   :  { %v1109_v60 = vadd.f32 %v1144_v58, %v1108_v59 }
0x124c   :  { %v1425_v61 = vpop.f32.mrf.mxu0 }
0x124d   :  { %1113 = vst.msk [vmem:[%s1816_s3] sm:$0xff] %vm1112_vm6, %v1109_v60 }
0x124e   :  { %1118 = vsyncpa [#allocation3], 1 }
0x124f   :  { %1119 = vsyncpa [#allocation5], 1 }

</bundles_post_ra>
